<compile_context>
chip_gen: v7x
topology: tpu7x:2x2x1
jax: 0.10.0
libtpu: 0.0.40
codegen_flags: <defaults>
</compile_context>

<pallas_src>
import functools

import numpy as np
import jax
import jax.numpy as jnp
from jax import lax
from jax.experimental import pallas as pl
from jax.experimental.pallas import tpu as pltpu


def _round_up(x, m):
    return (x + m - 1) // m * m


# ---------------------------------------------------------------------------
# Pallas kernel: fused 3x3 conv (stride 1, pad 1) + per-channel scale/bias + ReLU
#
# grid = (M blocks over B*H image rows, N blocks over Cout, 3 row taps)
#   x_ref : (tr, Wp+2, Cin)  bf16  row-tap-shifted input rows (full padded width)
#   w_ref : (3, Cin, tn)     bf16  weights of this row tap, all 3 column taps
#   s_ref : (1, tn)          f32   folded BN scale
#   b_ref : (1, tn)          f32   folded BN/conv bias
#   o_ref : (tr*Wp, tn)      f32
#   acc   : (tr*Wp, tn)      f32   VMEM scratch accumulator
# ---------------------------------------------------------------------------
def _conv3x3_kernel(x_ref, w_ref, s_ref, b_ref, o_ref, acc_ref, *, wp, relu):
    ki = pl.program_id(2)

    @pl.when(ki == 0)
    def _init():
        acc_ref[...] = jnp.zeros_like(acc_ref)

    tr = x_ref.shape[0]
    cin = x_ref.shape[2]
    for kj in range(3):  # column taps: static shifts of the VMEM-resident tile
        xs = x_ref[:, kj:kj + wp, :].reshape(tr * wp, cin)
        acc_ref[...] += jnp.dot(xs, w_ref[kj],
                                preferred_element_type=jnp.float32)

    @pl.when(ki == pl.num_programs(2) - 1)
    def _fin():
        y = acc_ref[...] * s_ref[...] + b_ref[...]
        if relu:
            y = jnp.maximum(y, 0.0)
        o_ref[...] = y.astype(o_ref.dtype)


@functools.lru_cache(maxsize=None)
def _build_conv3x3(R, Wp, Cin, Np, tr, tn, relu):
    kernel = functools.partial(_conv3x3_kernel, wp=Wp, relu=relu)
    grid = (R // tr, Np // tn, 3)
    return pl.pallas_call(
        kernel,
        out_shape=jax.ShapeDtypeStruct((R * Wp, Np), jnp.float32),
        grid_spec=pltpu.PrefetchScalarGridSpec(
            num_scalar_prefetch=0,
            grid=grid,
            in_specs=[
                pl.BlockSpec((None, tr, Wp + 2, Cin), lambda i, j, k: (k, i, 0, 0)),
                pl.BlockSpec((None, 3, Cin, tn), lambda i, j, k: (k, 0, 0, j)),
                pl.BlockSpec((1, tn), lambda i, j, k: (0, j)),
                pl.BlockSpec((1, tn), lambda i, j, k: (0, j)),
            ],
            out_specs=pl.BlockSpec((tr * Wp, tn), lambda i, j, k: (i, j)),
            scratch_shapes=[pltpu.VMEM((tr * Wp, tn), jnp.float32)],
        ),
        compiler_params=pltpu.CompilerParams(
            dimension_semantics=("parallel", "parallel", "arbitrary"),
            vmem_limit_bytes=32 * 1024 * 1024,
        ),
    )


def _pick_tiles(R, Wp, Np):
    """Pick (tr rows per M tile, tn output-channel tile)."""
    tn = 256 if Np % 256 == 0 else 128
    max_rows = max(1, 1024 // Wp)          # target tm = tr*Wp in ~[Wp, 1024]
    tr = 1
    for d in range(1, R + 1):
        if R % d == 0 and d <= max_rows:
            tr = d
    # keep >= 2 M blocks when possible so v7x's 2 TensorCores both get work
    if R // tr < 2:
        for d in range(tr, 0, -1):
            if R % d == 0 and R // d >= 2:
                tr = d
                break
    return tr, tn


# ---------------------------------------------------------------------------
# ChannelChange forward (NCHW in -> NCHW out), eval-mode BN folded into scale/bias
# ---------------------------------------------------------------------------
def channel_change(params, x_nchw):
    w, scale, bias = params['w'], params['scale'], params['bias']
    B, Cin, H, W = x_nchw.shape
    Cout = w.shape[-1]

    x = jnp.transpose(x_nchw, (0, 2, 3, 1)).astype(jnp.float32)      # NHWC

    Wp = _round_up(W, 16)          # keep bf16 sublane tiling / in-kernel reshape clean
    Np = _round_up(Cout, 128)      # lane-dense output stores
    R = B * H
    tr, tn = _pick_tiles(R, Wp, Np)

    # conv padding (1,1) in H/W plus extra right-side W padding up to Wp
    xp = jnp.pad(x, ((0, 0), (1, 1), (1, 1 + Wp - W), (0, 0)))
    # 3 row-tap-shifted copies stacked on a leading tap axis (only 3x, not 9x im2col)
    xs = jnp.stack([xp[:, ki:ki + H] for ki in range(3)], axis=0)    # (3,B,H,Wp+2,Cin)
    xs = xs.reshape(3, R, Wp + 2, Cin).astype(jnp.bfloat16)

    wk = jnp.pad(w, ((0, 0), (0, 0), (0, 0), (0, Np - Cout))).astype(jnp.bfloat16)
    sp = jnp.pad(scale.astype(jnp.float32), (0, Np - Cout)).reshape(1, Np)
    bp = jnp.pad(bias.astype(jnp.float32), (0, Np - Cout)).reshape(1, Np)

    fn = _build_conv3x3(R, Wp, Cin, Np, tr, tn, True)
    out = fn(xs, wk, sp, bp)                                         # (R*Wp, Np) f32
    out = out.reshape(B, H, Wp, Np)[:, :, :W, :Cout]
    return jnp.transpose(out, (0, 3, 1, 2))                          # NCHW


# ---------------------------------------------------------------------------
# deterministic synthetic parameters (conv bias + eval-mode BatchNorm folded)
# TODO(synk): training-mode BatchNorm (batch statistics update) is not implemented;
# BN is folded in inference form, matching .eval() semantics.
# ---------------------------------------------------------------------------
def make_channel_change_params(key, cin, cout):
    ks = jax.random.split(key, 6)
    fan_in = cin * 9
    w = jax.random.normal(ks[0], (3, 3, cin, cout), jnp.float32) / np.sqrt(fan_in)
    conv_b = 0.01 * jax.random.normal(ks[1], (cout,), jnp.float32)
    gamma = 1.0 + 0.05 * jax.random.normal(ks[2], (cout,), jnp.float32)
    beta = 0.05 * jax.random.normal(ks[3], (cout,), jnp.float32)
    mean = 0.05 * jax.random.normal(ks[4], (cout,), jnp.float32)
    var = jnp.abs(1.0 + 0.05 * jax.random.normal(ks[5], (cout,), jnp.float32))
    eps = 1e-5
    scale = gamma / jnp.sqrt(var + eps)
    shift = beta + (conv_b - mean) * scale
    return {'w': w, 'scale': scale, 'bias': shift}


# ---------------------------------------------------------------------------
# main
# ---------------------------------------------------------------------------
if __name__ == "__main__":
    B, Cin, Cout, H, W = 2, 32, 64, 16, 16

    key = jax.random.PRNGKey(0)
    kp, kx = jax.random.split(key)
    params = make_channel_change_params(kp, Cin, Cout)
    x = jax.random.normal(kx, (B, Cin, H, W), jnp.float32)

    fwd = jax.jit(channel_change)
    y = jax.block_until_ready(fwd(params, x))
    assert y.shape == (B, Cout, H, W)
    assert bool(jnp.all(jnp.isfinite(y)))

    # reference: same bf16 operands, f32 accumulation, f32 BN/ReLU epilogue
    xr = jnp.transpose(x, (0, 2, 3, 1)).astype(jnp.bfloat16)
    ref = lax.conv_general_dilated(
        xr, params['w'].astype(jnp.bfloat16),
        window_strides=(1, 1), padding=((1, 1), (1, 1)),
        dimension_numbers=('NHWC', 'HWIO', 'NHWC'),
        preferred_element_type=jnp.float32)
    ref = jnp.maximum(ref * params['scale'] + params['bias'], 0.0)
    ref = jnp.transpose(ref, (0, 3, 1, 2))
    err = float(jnp.max(jnp.abs(y - ref)))
    assert err < 2e-2, f"max abs err {err}"

    print("KERNEL_OK")
</pallas_src>

<mosaic_0001>
module attributes {stable_mosaic.version = 11 : i64} {
  func.func @_conv3x3_kernel(%arg0: i32, %arg1: i32, %arg2: i32, %arg3: memref<1x16x18x32xbf16, #tpu.memory_space<vmem>>, %arg4: memref<1x3x32x128xbf16, #tpu.memory_space<vmem>>, %arg5: memref<1x128xf32, #tpu.memory_space<vmem>>, %arg6: memref<1x128xf32, #tpu.memory_space<vmem>>, %arg7: memref<256x128xf32, #tpu.memory_space<vmem>>, %arg8: memref<256x128xf32, #tpu.memory_space<vmem>>) attributes {dimension_semantics = [#tpu.dimension_semantics<parallel>, #tpu.dimension_semantics<parallel>, #tpu.dimension_semantics<arbitrary>], iteration_bounds = array<i64: 2, 1, 3>, scalar_prefetch = 0 : i64, scratch_operands = 1 : i64, tpu.core_type = #tpu.core_type<tc>, window_params = [{transform_indices = @transform_0, window_bounds = array<i64: 1, 16, 18, 32>}, {transform_indices = @transform_1, window_bounds = array<i64: 1, 3, 32, 128>}, {transform_indices = @transform_2, window_bounds = array<i64: 1, 128>}, {transform_indices = @transform_3, window_bounds = array<i64: 1, 128>}, {transform_indices = @transform_4, window_bounds = array<i64: 256, 128>}]} {
    %c0_i32 = arith.constant 0 : i32
    %0 = arith.cmpi eq, %arg2, %c0_i32 : i32
    %1 = arith.extui %0 : i1 to i32
    %c0_i32_0 = arith.constant 0 : i32
    %2 = arith.cmpi ne, %1, %c0_i32_0 : i32
    scf.if %2 {
      %cst_37 = arith.constant 0.000000e+00 : f32
      %33 = vector.broadcast %cst_37 : f32 to vector<256x128xf32>
      %c0_38 = arith.constant 0 : index
      %c0_39 = arith.constant 0 : index
      %34 = vector.load %arg8[%c0_38, %c0_39] : memref<256x128xf32, #tpu.memory_space<vmem>>, vector<256x128xf32>
      tpu.vector_store %arg8[%c0_38, %c0_39], %33 {strides = array<i32>} : memref<256x128xf32, #tpu.memory_space<vmem>>, vector<256x128xf32>,
    } else {
    }
    %c0 = arith.constant 0 : index
    %c0_1 = arith.constant 0 : index
    %c0_2 = arith.constant 0 : index
    %c0_3 = arith.constant 0 : index
    %3 = vector.load %arg3[%c0, %c0_1, %c0_2, %c0_3] : memref<1x16x18x32xbf16, #tpu.memory_space<vmem>>, vector<1x16x16x32xbf16>
    %4 = vector.shape_cast %3 : vector<1x16x16x32xbf16> to vector<16x16x32xbf16>
    %5 = vector.shape_cast %4 : vector<16x16x32xbf16> to vector<256x32xbf16>
    %c0_4 = arith.constant 0 : index
    %c0_5 = arith.constant 0 : index
    %6 = vector.load %arg8[%c0_4, %c0_5] : memref<256x128xf32, #tpu.memory_space<vmem>>, vector<256x128xf32>
    %c0_6 = arith.constant 0 : index
    %c0_7 = arith.constant 0 : index
    %c0_8 = arith.constant 0 : index
    %c0_9 = arith.constant 0 : index
    %7 = vector.load %arg4[%c0_6, %c0_7, %c0_8, %c0_9] : memref<1x3x32x128xbf16, #tpu.memory_space<vmem>>, vector<1x1x32x128xbf16>
    %8 = vector.shape_cast %7 : vector<1x1x32x128xbf16> to vector<32x128xbf16>
    %cst = arith.constant dense<0.000000e+00> : vector<256x128xf32>
    %9 = tpu.matmul %5, %8, %cst {dimension_numbers = #tpu.dot_dimension_numbers<[1], [0], [0], [1], [0, 0, 1, 1], [], []>} : vector<256x32xbf16>, vector<32x128xbf16>, vector<256x128xf32> -> vector<256x128xf32>
    %10 = arith.addf %6, %9 : vector<256x128xf32>
    %c0_10 = arith.constant 0 : index
    %c0_11 = arith.constant 0 : index
    %11 = vector.load %arg8[%c0_10, %c0_11] : memref<256x128xf32, #tpu.memory_space<vmem>>, vector<256x128xf32>
    tpu.vector_store %arg8[%c0_10, %c0_11], %10 {strides = array<i32>} : memref<256x128xf32, #tpu.memory_space<vmem>>, vector<256x128xf32>,
    %c0_12 = arith.constant 0 : index
    %c0_13 = arith.constant 0 : index
    %c1 = arith.constant 1 : index
    %c0_14 = arith.constant 0 : index
    %12 = vector.load %arg3[%c0_12, %c0_13, %c1, %c0_14] : memref<1x16x18x32xbf16, #tpu.memory_space<vmem>>, vector<1x16x16x32xbf16>
    %13 = vector.shape_cast %12 : vector<1x16x16x32xbf16> to vector<16x16x32xbf16>
    %14 = vector.shape_cast %13 : vector<16x16x32xbf16> to vector<256x32xbf16>
    %c0_15 = arith.constant 0 : index
    %c0_16 = arith.constant 0 : index
    %15 = vector.load %arg8[%c0_15, %c0_16] : memref<256x128xf32, #tpu.memory_space<vmem>>, vector<256x128xf32>
    %c0_17 = arith.constant 0 : index
    %c1_18 = arith.constant 1 : index
    %c0_19 = arith.constant 0 : index
    %c0_20 = arith.constant 0 : index
    %16 = vector.load %arg4[%c0_17, %c1_18, %c0_19, %c0_20] : memref<1x3x32x128xbf16, #tpu.memory_space<vmem>>, vector<1x1x32x128xbf16>
    %17 = vector.shape_cast %16 : vector<1x1x32x128xbf16> to vector<32x128xbf16>
    %cst_21 = arith.constant dense<0.000000e+00> : vector<256x128xf32>
    %18 = tpu.matmul %14, %17, %cst_21 {dimension_numbers = #tpu.dot_dimension_numbers<[1], [0], [0], [1], [0, 0, 1, 1], [], []>} : vector<256x32xbf16>, vector<32x128xbf16>, vector<256x128xf32> -> vector<256x128xf32>
    %19 = arith.addf %15, %18 : vector<256x128xf32>
    %c0_22 = arith.constant 0 : index
    %c0_23 = arith.constant 0 : index
    %20 = vector.load %arg8[%c0_22, %c0_23] : memref<256x128xf32, #tpu.memory_space<vmem>>, vector<256x128xf32>
    tpu.vector_store %arg8[%c0_22, %c0_23], %19 {strides = array<i32>} : memref<256x128xf32, #tpu.memory_space<vmem>>, vector<256x128xf32>,
    %c0_24 = arith.constant 0 : index
    %c0_25 = arith.constant 0 : index
    %c2 = arith.constant 2 : index
    %c0_26 = arith.constant 0 : index
    %21 = vector.load %arg3[%c0_24, %c0_25, %c2, %c0_26] : memref<1x16x18x32xbf16, #tpu.memory_space<vmem>>, vector<1x16x16x32xbf16>
    %22 = vector.shape_cast %21 : vector<1x16x16x32xbf16> to vector<16x16x32xbf16>
    %23 = vector.shape_cast %22 : vector<16x16x32xbf16> to vector<256x32xbf16>
    %c0_27 = arith.constant 0 : index
    %c0_28 = arith.constant 0 : index
    %24 = vector.load %arg8[%c0_27, %c0_28] : memref<256x128xf32, #tpu.memory_space<vmem>>, vector<256x128xf32>
    %c0_29 = arith.constant 0 : index
    %c2_30 = arith.constant 2 : index
    %c0_31 = arith.constant 0 : index
    %c0_32 = arith.constant 0 : index
    %25 = vector.load %arg4[%c0_29, %c2_30, %c0_31, %c0_32] : memref<1x3x32x128xbf16, #tpu.memory_space<vmem>>, vector<1x1x32x128xbf16>
    %26 = vector.shape_cast %25 : vector<1x1x32x128xbf16> to vector<32x128xbf16>
    %cst_33 = arith.constant dense<0.000000e+00> : vector<256x128xf32>
    %27 = tpu.matmul %23, %26, %cst_33 {dimension_numbers = #tpu.dot_dimension_numbers<[1], [0], [0], [1], [0, 0, 1, 1], [], []>} : vector<256x32xbf16>, vector<32x128xbf16>, vector<256x128xf32> -> vector<256x128xf32>
    %28 = arith.addf %24, %27 : vector<256x128xf32>
    %c0_34 = arith.constant 0 : index
    %c0_35 = arith.constant 0 : index
    %29 = vector.load %arg8[%c0_34, %c0_35] : memref<256x128xf32, #tpu.memory_space<vmem>>, vector<256x128xf32>
    tpu.vector_store %arg8[%c0_34, %c0_35], %28 {strides = array<i32>} : memref<256x128xf32, #tpu.memory_space<vmem>>, vector<256x128xf32>,
    %c2_i32 = arith.constant 2 : i32
    %30 = arith.cmpi eq, %arg2, %c2_i32 : i32
    %31 = arith.extui %30 : i1 to i32
    %c0_i32_36 = arith.constant 0 : i32
    %32 = arith.cmpi ne, %31, %c0_i32_36 : i32
    scf.if %32 {
      %c0_37 = arith.constant 0 : index
      %c0_38 = arith.constant 0 : index
      %33 = vector.load %arg8[%c0_37, %c0_38] : memref<256x128xf32, #tpu.memory_space<vmem>>, vector<256x128xf32>
      %c0_39 = arith.constant 0 : index
      %c0_40 = arith.constant 0 : index
      %34 = vector.load %arg5[%c0_39, %c0_40] : memref<1x128xf32, #tpu.memory_space<vmem>>, vector<1x128xf32>
      %35 = vector.broadcast %34 : vector<1x128xf32> to vector<256x128xf32>
      %36 = arith.mulf %33, %35 : vector<256x128xf32>
      %c0_41 = arith.constant 0 : index
      %c0_42 = arith.constant 0 : index
      %37 = vector.load %arg6[%c0_41, %c0_42] : memref<1x128xf32, #tpu.memory_space<vmem>>, vector<1x128xf32>
      %38 = vector.broadcast %37 : vector<1x128xf32> to vector<256x128xf32>
      %39 = arith.addf %36, %38 : vector<256x128xf32>
      %cst_43 = arith.constant 0.000000e+00 : f32
      %40 = vector.broadcast %cst_43 : f32 to vector<256x128xf32>
      %41 = arith.maximumf %39, %40 : vector<256x128xf32>
      %c0_44 = arith.constant 0 : index
      %c0_45 = arith.constant 0 : index
      %42 = vector.load %arg7[%c0_44, %c0_45] : memref<256x128xf32, #tpu.memory_space<vmem>>, vector<256x128xf32>
      tpu.vector_store %arg7[%c0_44, %c0_45], %41 {strides = array<i32>} : memref<256x128xf32, #tpu.memory_space<vmem>>, vector<256x128xf32>,
    } else {
    }
    return
  }
  func.func @transform_0(%arg0: i32, %arg1: i32, %arg2: i32) -> (i32, i32, i32, i32) {
    %c0_i32 = arith.constant 0 : i32
    %c0_i32_0 = arith.constant 0 : i32
    %c0_i32_1 = arith.constant 0 : i32
    return %arg2, %arg0, %c0_i32, %c0_i32_0 : i32, i32, i32, i32
  }
  func.func @transform_1(%arg0: i32, %arg1: i32, %arg2: i32) -> (i32, i32, i32, i32) {
    %c0_i32 = arith.constant 0 : i32
    %c0_i32_0 = arith.constant 0 : i32
    %c0_i32_1 = arith.constant 0 : i32
    return %arg2, %c0_i32, %c0_i32_0, %arg1 : i32, i32, i32, i32
  }
  func.func @transform_2(%arg0: i32, %arg1: i32, %arg2: i32) -> (i32, i32) {
    %c0_i32 = arith.constant 0 : i32
    %c0_i32_0 = arith.constant 0 : i32
    return %c0_i32, %arg1 : i32, i32
  }
  func.func @transform_3(%arg0: i32, %arg1: i32, %arg2: i32) -> (i32, i32) {
    %c0_i32 = arith.constant 0 : i32
    %c0_i32_0 = arith.constant 0 : i32
    return %c0_i32, %arg1 : i32, i32
  }
  func.func @transform_4(%arg0: i32, %arg1: i32, %arg2: i32) -> (i32, i32) {
    %c0_i32 = arith.constant 0 : i32
    return %arg0, %arg1 : i32, i32
  }
}

</mosaic_0001>

<bundles_post_ra>
// kernel: channel_change.1
= control target key start
LH: loop header
LB: loop body
LE: loop exit
PB: predicated region body
PF: predicated region fallthrough
CT: control target
= control target key end

     0   :  { %s3105_s15 = smov 0   ;;  %s3107_s16 = smov 0   ;;  %s3638_s0 = inlined_call_operand.vmem [shape: bf16[3,32,18,32], index: 0, kind: input, shape index: {}]   ;;  %s3639_s1 = inlined_call_operand.vmem [shape: bf16[3,3,32,128], index: 1, kind: input, shape index: {}]   ;;  %s3640_s2 = inlined_call_operand.vmem [shape: f32[1,128], index: 2, kind: input, shape index: {}]   ;;  %s3641_s3 = inlined_call_operand.vmem [shape: f32[1,128], index: 3, kind: input, shape index: {}]   ;;  %s3642_s4 = inlined_call_operand.vmem [shape: f32[512,128], index: 4, kind: output, shape index: {}]  }
   0x1   :  { %s3109_s17 = smov 0   ;;  %s3111_s18 = smov 0  }
   0x2   :  { %s3113_s19 = smov 0  }
   0x3 LB: > { %s26_s20 = sadd.s32 1, %s3069_s17  ;;  %s33_s21 = sadd.s32 1, %s3073_s18  ;;  %s3077_s19 = sphi %s3113_s19, %s14_s19   ;;  %s3073_s18 = sphi %s3111_s18, %s3650_s18   ;;  %s3069_s17 = sphi %s3109_s17, %s3649_s17   ;;  %s3065_s16 = sphi %s3107_s16, %s3648_s16   ;;  %s3061_s15 = sphi %s3105_s15, %s3647_s15  }
   0x4   : > { %p27_p0 = scmp.ge.s32.totalorder %s26_s20, 3  ;;  %p2477_p1 = scmp.ge.s32.totalorder %s3077_s19, 1 }
   0x5   : > { %p222_p2 = scmp.lt.s32.totalorder %s3077_s19, 7 }
   0x6   : > { %s3652_s20 = smov (%p27_p0, %s26_s20), 0  ;;  %s3654_s21 = smov (!%p27_p0, %s33_s21), %s3073_s18 }
   0x7   : > { %p223_p3 = pnand %p2477_p1, %p222_p2  ;;  %p35_p4 = scmp.ge.s32.totalorder %s3654_s21, 2 }
   0x8   : > { %s2478_s22 = sshll.u32 (!%p223_p3), %s3065_s16, 4  ;;  %p271_p5 = scmp.lt.s32.totalorder (!%p223_p3), %s3061_s15, 2 }
   0x9   : > { %s3656_s21 = smov (%p35_p4, %s3654_s21), 0  ;;  %226 = sbr.rel (%p223_p3) target bundleno = 375 (0x177), region = 36 }
   0xa   : > { %p273_p6 = scmp.lt.s32.totalorder (!%p223_p3), %s2478_s22, 31  ;;  %s2481_s23 = sshll.u32 (!%p223_p3), %s3065_s16, 5 }
   0xb   : > { %p296_p7 = scmp.lt.s32.totalorder (!%p223_p3), %s2481_s23, 63  ;;  %p2483_p8 = scmp.ne.s32.totalorder (!%p223_p3), %s3061_s15, 0 }
  0x10   : > { %s272_s24 = scalar_select %p271_p5, %s3061_s15, 2 }
  0x11   : > { %s3658_s22 = smov (!%p273_p6, %s2478_s22), 31  ;;  %s3660_s23 = smov (!%p296_p7, %s2481_s23), 63 }
  0x12   : > { %s2974_s25 = smul.u32 96, %s272_s24  ;;  %s2482_s10 = sshll.u32 %s3660_s23, 3  ;;  %v3079_v0 = vmov (!%p2483_p8), 0.0  }
  0x13   : > { %s2973_s26 = smul.u32 3, %s3658_s22  ;;  %s3156_s13 = scalar_lea.vmem %s3642_s4, %s2482_s10  ;;  %309 = vst [vmem:[#allocation2] sm:$0xff] (!%p2483_p8), %v3079_v0  ;;  %310 = vst [vmem:[#allocation2 + $0x8] sm:$0xff] (!%p2483_p8), %v3079_v0 }
  0x14   : > { %s2975_s27 = smul.u32 48, %s272_s24  ;;  %311 = vst [vmem:[#allocation2 + $0x10] sm:$0xff] (!%p2483_p8), %v3079_v0  ;;  %312 = vst [vmem:[#allocation2 + $0x18] sm:$0xff] (!%p2483_p8), %v3079_v0 }
  0x15   : > { %s277_s28 = sadd.s32 %s2974_s25, %s2973_s26  ;;  %308 = sbr.rel (%p2483_p8) target bundleno = 35 (0x23), region = 40  ;;  %313 = vst [vmem:[#allocation2 + $0x20] sm:$0xff] (!%p2483_p8), %v3079_v0  ;;  %314 = vst [vmem:[#allocation2 + $0x28] sm:$0xff] (!%p2483_p8), %v3079_v0 }
  0x16   : > { %s2479_s29 = sshll.u32 %s277_s28, 2  ;;  %s3146_s6 = scalar_lea.vmem %s3639_s1, %s2975_s27  ;;  %315 = vst [vmem:[#allocation2 + $0x30] sm:$0xff] (!%p2483_p8), %v3079_v0  ;;  %316 = vst [vmem:[#allocation2 + $0x38] sm:$0xff] (!%p2483_p8), %v3079_v0 }
  0x17   : > { %s3151_s9 = scalar_lea.vmem %s3638_s0, %s2479_s29  ;;  %317 = vst [vmem:[#allocation2 + $0x40] sm:$0xff] (!%p2483_p8), %v3079_v0  ;;  %318 = vst [vmem:[#allocation2 + $0x48] sm:$0xff] (!%p2483_p8), %v3079_v0 }
  0x18   : > { %319 = vst [vmem:[#allocation2 + $0x50] sm:$0xff] (!%p2483_p8), %v3079_v0  ;;  %320 = vst [vmem:[#allocation2 + $0x58] sm:$0xff] (!%p2483_p8), %v3079_v0 }
  0x19   : > { %321 = vst [vmem:[#allocation2 + $0x60] sm:$0xff] (!%p2483_p8), %v3079_v0  ;;  %322 = vst [vmem:[#allocation2 + $0x68] sm:$0xff] (!%p2483_p8), %v3079_v0 }
  0x1a   : > { %323 = vst [vmem:[#allocation2 + $0x70] sm:$0xff] (!%p2483_p8), %v3079_v0  ;;  %324 = vst [vmem:[#allocation2 + $0x78] sm:$0xff] (!%p2483_p8), %v3079_v0 }
  0x1b   : > { %325 = vst [vmem:[#allocation2 + $0x80] sm:$0xff] (!%p2483_p8), %v3079_v0  ;;  %326 = vst [vmem:[#allocation2 + $0x88] sm:$0xff] (!%p2483_p8), %v3079_v0 }
  0x1c   : > { %327 = vst [vmem:[#allocation2 + $0x90] sm:$0xff] %v3079_v0  ;;  %328 = vst [vmem:[#allocation2 + $0x98] sm:$0xff] %v3079_v0 }
  0x1d   : > { %329 = vst [vmem:[#allocation2 + $0xa0] sm:$0xff] %v3079_v0  ;;  %330 = vst [vmem:[#allocation2 + $0xa8] sm:$0xff] %v3079_v0 }
  0x1e   : > { %331 = vst [vmem:[#allocation2 + $0xb0] sm:$0xff] %v3079_v0  ;;  %332 = vst [vmem:[#allocation2 + $0xb8] sm:$0xff] %v3079_v0 }
  0x1f   : > { %333 = vst [vmem:[#allocation2 + $0xc0] sm:$0xff] %v3079_v0  ;;  %334 = vst [vmem:[#allocation2 + $0xc8] sm:$0xff] %v3079_v0 }
  0x20   : > { %335 = vst [vmem:[#allocation2 + $0xd0] sm:$0xff] %v3079_v0  ;;  %336 = vst [vmem:[#allocation2 + $0xd8] sm:$0xff] %v3079_v0 }
  0x21   : > { %337 = vst [vmem:[#allocation2 + $0xe0] sm:$0xff] %v3079_v0  ;;  %338 = vst [vmem:[#allocation2 + $0xe8] sm:$0xff] %v3079_v0 }
  0x22   : > { %339 = vst [vmem:[#allocation2 + $0xf0] sm:$0xff] %v3079_v0  ;;  %340 = vst [vmem:[#allocation2 + $0xf8] sm:$0xff] %v3079_v0 }
  0x23 PF: > { %v3017_v1 = vld [vmem:[%s3146_s6] sm:$0xff]   ;;  %v3018_v2 = vld [vmem:[%s3146_s6 + $0x10] sm:$0xff]   ;;  %v3019_v3 = vld [vmem:[%s3146_s6 + $0x8] sm:$0xff]   ;;  %vm501_vm0 = vcmask 261120   ;;  %vm823_vm1 = vsmask.f32 3328 }
  0x24   : > { %2669 = vmatprep.subr.bf16.mxu1 %v3017_v1  ;;  %2705 = vmatprep.subr.bf16.mxu0 %v3018_v2  ;;  %v3020_v4 = vld [vmem:[%s3146_s6 + $0x18] sm:$0xff]   ;;  %v3021_v5 = vld [vmem:[%s3151_s9] sm:$0xff]   ;;  %v3022_v6 = vld [vmem:[%s3151_s9 + $0xc] sm:$0xff]   ;;  %vm824_vm2 = vsmask.f32 7440  ;;  %vm1676_vm4 = vcmask 1042432  }
  0x25   : > { %2670 = vmatpush3.bf16.msra.mxu1 %v3017_v1  ;;  %2706 = vmatpush3.bf16.msra.mxu0 %v3018_v2  ;;  %v775_v7 = vld [vmem:[%s3151_s9] sm:$0xf]  ;;  %v776_v8 = vld [vmem:[%s3151_s9 + $0x4] sm:$0xf]  ;;  %v777_v9 = vld [vmem:[%s3151_s9 + $0x8] sm:$0x1] }
  0x26   : > { %2671 = vmatprep.subr.bf16.mxu1 %v3019_v3  ;;  %2707 = vmatprep.subr.bf16.mxu0 %v3020_v4  ;;  %v827_v10 = vshrl.u32 %v775_v7, 16  ;;  %v830_v11 = vshll.u32 %v775_v7, 16  ;;  %v836_v12 = vshll.u32 %v776_v8, 16  ;;  %v840_v13 = vshrl.u32 %v776_v8, 16  ;;  %v778_v15 = vld [vmem:[%s3151_s9 + $0xc] sm:$0xf]  ;;  %vm3177_vm3 = vmor %vm823_vm1, %vm824_vm2 }
  0x27   : > { %2673 = vmatprep.mubr.msk.bf16.mxu1 %vm501_vm0, %v3021_v5  ;;  %v846_v14 = vshll.u32 %v777_v9, 16  ;;  %v3023_v16 = vld [vmem:[%s3151_s9 + $0x18] sm:$0xff]   ;;  %v779_v19 = vld [vmem:[%s3151_s9 + $0x10] sm:$0xf]  ;;  %v780_v20 = vld [vmem:[%s3151_s9 + $0x14] sm:$0x1] }
  0x28   : > { %v829_v17 = vrot.slane %v827_v10, 4  ;;  %v832_v18 = vrot.slane %v830_v11, 5  ;;  %v838_v21 = vrot.slane %v836_v12, 5  ;;  %v842_v22 = vrot.slane %v840_v13, 4  ;;  %v781_v37 = vld [vmem:[%s3151_s9 + $0x18] sm:$0xf] }
  0x29   : > { %2672 = vmatpush3.bf16.msra.mxu1 %v3019_v3  ;;  %2708 = vmatpush3.bf16.msra.mxu0 %v3020_v4  ;;  %v848_v23 = vrot.slane %v846_v14, 5  ;;  %v851_v24 = vshrl.u32 %v778_v15, 16  ;;  %v854_v26 = vshll.u32 %v778_v15, 16  ;;  %v860_v27 = vshll.u32 %v779_v19, 16  ;;  %v3024_v40 = vld [vmem:[%s3151_s9 + $0x24] sm:$0xff]   ;;  %v3026_v54 = vld [vmem:[%s3151_s9 + $0x30] sm:$0xff]  }
  0x2a   : > { %2777 = vmatprep.subr.bf16.mxu1 %v3018_v2  ;;  %v833_v25 = vor.u32 %v832_v18, %v829_v17  ;;  %v864_v28 = vshrl.u32 %v779_v19, 16  ;;  %v843_v30 = vor.u32 %v842_v22, %v838_v21  ;;  %v870_v32 = vshll.u32 %v780_v20, 16  ;;  %v782_v41 = vld [vmem:[%s3151_s9 + $0x1c] sm:$0xf]  ;;  %v783_v45 = vld [vmem:[%s3151_s9 + $0x20] sm:$0x1] }
  0x2b   : > { %v853_v31 = vrot.slane %v851_v24, 4  ;;  %v856_v34 = vrot.slane %v854_v26, 5  ;;  %v862_v35 = vrot.slane %v860_v27, 5  ;;  %v875_v46 = vshrl.u32 %v781_v37, 16  ;;  %v784_v47 = vld [vmem:[%s3151_s9 + $0x24] sm:$0xf] }
  0x2c   : > { %2674 = vmatmul.mubr.msk.bf16.vlgmr.msra.gmra.mrb[0].mxu1 %vm501_vm0, %v3022_v6  ;;  %v834_v33 = vrot.slane %v833_v25, 4  ;;  %v866_v36 = vrot.slane %v864_v28, 4  ;;  %v844_v38 = vrot.slane %v843_v30, 4  ;;  %v872_v39 = vrot.slane %v870_v32, 5  ;;  %v3025_v48 = vld [vmem:[%s3146_s6 + $0x20] sm:$0xff]   ;;  %v3028_v24 = vld [vmem:[%s3151_s9 + $0x48] sm:$0xff]  }
  0x2d   : > { %2779 = vmatpush3.bf16.msra.mxu1 %v3018_v2  ;;  %2677 = vmatprep.mubr.msk.bf16.mxu1 %vm501_vm0, %v3023_v16  ;;  %v857_v43 = vor.u32 %v856_v34, %v853_v31  ;;  %v878_v50 = vshll.u32 %v781_v37, 16  ;;  %v884_v51 = vshll.u32 %v782_v41, 16  ;;  %v888_v52 = vshrl.u32 %v782_v41, 16  ;;  %v785_v53 = vld [vmem:[%s3151_s9 + $0x28] sm:$0xf]  ;;  %v3027_v8 = vld [vmem:[%s3151_s9 + $0x3c] sm:$0xff]  }
  0x2e   : > { %2778 = vmatprep.subr.bf16.mxu1 %v3020_v4  ;;  %v839_v42 = vsel %vm3177_vm3, %v834_v33, %v838_v21  ;;  %v867_v44 = vor.u32 %v866_v36, %v862_v35  ;;  %v849_v49 = vsel %vm3177_vm3, %v844_v38, %v848_v23  ;;  %v877_v58 = vrot.slane %v875_v46, 4  ;;  %v786_v59 = vld [vmem:[%s3151_s9 + $0x2c] sm:$0x1]  ;;  %2741 = vmatprep.subr.bf16.mxu0 %v3025_v48  ;;  %v787_v13 = vld [vmem:[%s3151_s9 + $0x30] sm:$0xf]  ;;  %p2610_p9 = scmp.ne.s32.totalorder %s3061_s15, 2 }
  0x2f   : > { %v2522_v55 = vcombine.low %v839_v42, %v849_v49  ;;  %v858_v56 = vrot.slane %v857_v43, 4  ;;  %v880_v60 = vrot.slane %v878_v50, 5  ;;  %v886_v61 = vrot.slane %v884_v51, 5  ;;  %v788_v17 = vld [vmem:[%s3151_s9 + $0x34] sm:$0xf] }
  0x30   : > { %v868_v57 = vrot.slane %v867_v44, 4  ;;  %v890_v62 = vrot.slane %v888_v52, 4  ;;  %v894_v63 = vshll.u32 %v783_v45, 16  ;;  %v899_v2 = vshrl.u32 %v784_v47, 16  ;;  %v789_v22 = vld [vmem:[%s3151_s9 + $0x38] sm:$0x1] }
  0x31   : > { %2780 = vmatpush3.bf16.msra.mxu1 %v3020_v4  ;;  %2709 = vmatprep.mubr.msk.bf16.mxu0 %vm501_vm0, %v2522_v55  ;;  %v863_v0 = vsel %vm3177_vm3, %v858_v56, %v862_v35  ;;  %v902_v3 = vshll.u32 %v784_v47, 16  ;;  %v881_v5 = vor.u32 %v880_v60, %v877_v58  ;;  %v908_v11 = vshll.u32 %v785_v53, 16  ;;  %v790_v30 = vld [vmem:[%s3151_s9 + $0x3c] sm:$0xf]  ;;  %v791_v31 = vld [vmem:[%s3151_s9 + $0x40] sm:$0xf] }
  0x32   : > { %v873_v1 = vsel %vm3177_vm3, %v868_v57, %v872_v39  ;;  %v891_v6 = vor.u32 %v890_v62, %v886_v61  ;;  %v896_v7 = vrot.slane %v894_v63, 5  ;;  %v901_v9 = vrot.slane %v899_v2, 4  ;;  %v792_v36 = vld [vmem:[%s3151_s9 + $0x44] sm:$0x1]  ;;  %v793_v49 = vld [vmem:[%s3151_s9 + $0x48] sm:$0xf] }
  0x33   : > { %v2523_v4 = vcombine.low %v863_v0, %v873_v1  ;;  %v904_v10 = vrot.slane %v902_v3, 5  ;;  %v912_v12 = vshrl.u32 %v785_v53, 16  ;;  %v882_v14 = vrot.slane %v881_v5, 4  ;;  %v794_v60 = vld [vmem:[%s3151_s9 + $0x4c] sm:$0xf] }
  0x34   : > { %2678 = vmatmul.mubr.msk.bf16.gmra.mrb[4].mxu1 %vm501_vm0, %v3024_v40  ;;  %v892_v15 = vrot.slane %v891_v6, 4  ;;  %v918_v16 = vshll.u32 %v786_v59, 16  ;;  %v923_v18 = vshrl.u32 %v787_v13, 16  ;;  %v910_v20 = vrot.slane %v908_v11, 5  ;;  %v3029_v59 = vld [vmem:[%s3151_s9 + $0x54] sm:$0xff]  }
  0x35   : > { %2681 = vmatprep.mubr.msk.bf16.mxu1 %vm501_vm0, %v3026_v54  ;;  %2710 = vmatmul.mubr.msk.bf16.vlgmr.msra.gmra.mrb[0].mxu0 %vm501_vm0, %v2523_v4  ;;  %v905_v19 = vor.u32 %v904_v10, %v901_v9  ;;  %v914_v21 = vrot.slane %v912_v12, 4  ;;  %v926_v23 = vshll.u32 %v787_v13, 16  ;;  %v887_v25 = vsel %vm3177_vm3, %v882_v14, %v886_v61  ;;  %v3030_v54 = vld [vmem:[%s3146_s6 + $0x28] sm:$0xff]   ;;  %v795_v0 = vld [vmem:[%s3151_s9 + $0x50] sm:$0x1] }
  0x36   : > { %2742 = vmatpush3.bf16.msra.mxu0 %v3025_v48  ;;  %v897_v26 = vsel %vm3177_vm3, %v892_v15, %v896_v7  ;;  %v920_v27 = vrot.slane %v918_v16, 5  ;;  %v925_v28 = vrot.slane %v923_v18, 4  ;;  %v932_v37 = vshll.u32 %v788_v17, 16  ;;  %v796_v2 = vld [vmem:[%s3151_s9 + $0x54] sm:$0xf] }
  0x37   : > { %v2524_v32 = vcombine.low %v887_v25, %v897_v26  ;;  %v906_v33 = vrot.slane %v905_v19, 4  ;;  %v915_v34 = vor.u32 %v914_v21, %v910_v20  ;;  %v928_v35 = vrot.slane %v926_v23, 5  ;;  %2743 = vmatprep.subr.bf16.mxu0 %v3030_v54  ;;  %v797_v7 = vld [vmem:[%s3151_s9 + $0x58] sm:$0xf]  ;;  %v798_v12 = vld [vmem:[%s3151_s9 + $0x5c] sm:$0x1] }
  0x38   : > { %v936_v38 = vshrl.u32 %v788_v17, 16  ;;  %v942_v39 = vshll.u32 %v789_v22, 16  ;;  %v947_v40 = vshrl.u32 %v790_v30, 16  ;;  %v950_v44 = vshll.u32 %v790_v30, 16  ;;  %v3031_v21 = vld [vmem:[%s3151_s9 + $0x60] sm:$0xff]  }
  0x39   : > { %2713 = vmatprep.mubr.msk.bf16.mxu0 %vm501_vm0, %v2524_v32  ;;  %v911_v41 = vsel %vm3177_vm3, %v906_v33, %v910_v20  ;;  %v916_v42 = vrot.slane %v915_v34, 4  ;;  %v929_v43 = vor.u32 %v928_v35, %v925_v28  ;;  %v934_v45 = vrot.slane %v932_v37, 5  ;;  %v1581_v37 = vld [vmem:[%s3151_s9 + $0x4] sm:$0xf] }
  0x3a   : > { %v938_v46 = vrot.slane %v936_v38, 4  ;;  %v944_v47 = vrot.slane %v942_v39, 5  ;;  %v949_v48 = vrot.slane %v947_v40, 4  ;;  %v952_v52 = vrot.slane %v950_v44, 5  ;;  %2744 = vmatpush3.bf16.msra.mxu0 %v3030_v54  ;;  %v1585_v54 = vld [vmem:[%s3151_s9 + $0x14] sm:$0x1] }
  0x3b   : > { %v921_v50 = vsel %vm3177_vm3, %v916_v42, %v920_v27  ;;  %v930_v51 = vrot.slane %v929_v43, 4  ;;  %v956_v53 = vshll.u32 %v791_v31, 16  ;;  %vm1677_vm5 = vcmask 1046532   ;;  %v1582_v42 = vld [vmem:[%s3151_s9 + $0x8] sm:$0x1]  ;;  %v3033_v43 = vld [vmem:[%s3151_s9 + $0x78] sm:$0xff]  }
  0x3c   : > { %2682 = vmatmul.mubr.msk.bf16.gmra.mrb[8].mxu1 %vm501_vm0, %v3027_v8  ;;  %v2525_v55 = vcombine.low %v911_v41, %v921_v50  ;;  %v939_v56 = vor.u32 %v938_v46, %v934_v45  ;;  %v960_v57 = vshrl.u32 %v791_v31, 16  ;;  %v966_v58 = vshll.u32 %v792_v36, 16  ;;  %v1580_v31 = vld [vmem:[%s3151_s9] sm:$0xe]  ;;  %v3032_v36 = vld [vmem:[%s3151_s9 + $0x6c] sm:$0xff]   ;;  %vm3251_vm6 = vmor %vm1676_vm4, %vm1677_vm5 }
  0x3d   : > { %2685 = vmatprep.mubr.msk.bf16.mxu1 %vm501_vm0, %v3028_v24  ;;  %v935_v61 = vsel %vm3177_vm3, %v930_v51, %v934_v45  ;;  %v953_v62 = vor.u32 %v952_v52, %v949_v48  ;;  %v958_v63 = vrot.slane %v956_v53, 5  ;;  %v971_v1 = vshrl.u32 %v793_v49, 16  ;;  %v1583_v48 = vld [vmem:[%s3151_s9 + $0xc] sm:$0xe]  ;;  %v1584_v53 = vld [vmem:[%s3151_s9 + $0x10] sm:$0xf] }
  0x3e   : > { %2714 = vmatmul.mubr.msk.bf16.gmra.mrb[4].mxu0 %vm501_vm0, %v2525_v55  ;;  %v940_v3 = vrot.slane %v939_v56, 4  ;;  %v962_v4 = vrot.slane %v960_v57, 4  ;;  %v968_v5 = vrot.slane %v966_v58, 5  ;;  %v974_v6 = vshll.u32 %v793_v49, 16 }
  0x3f   : > { %v954_v8 = vrot.slane %v953_v62, 4  ;;  %v973_v9 = vrot.slane %v971_v1, 4  ;;  %v980_v10 = vshll.u32 %v794_v60, 16  ;;  %v984_v11 = vshrl.u32 %v794_v60, 16 }
  0x40   : > { %v945_v13 = vsel %vm3177_vm3, %v940_v3, %v944_v47  ;;  %v963_v14 = vor.u32 %v962_v4, %v958_v63  ;;  %v976_v15 = vrot.slane %v974_v6, 5  ;;  %v990_v16 = vshll.u32 %v795_v0, 16  ;;  %v1586_v0 = vld [vmem:[%s3151_s9 + $0x18] sm:$0xe]  ;;  %v1588_v6 = vld [vmem:[%s3151_s9 + $0x20] sm:$0x1] }
  0x41   : > { %v2526_v17 = vcombine.low %v935_v61, %v945_v13  ;;  %v959_v18 = vsel %vm3177_vm3, %v954_v8, %v958_v63  ;;  %v982_v19 = vrot.slane %v980_v10, 5  ;;  %v986_v20 = vrot.slane %v984_v11, 4  ;;  %v3034_v63 = vld [vmem:[%s3151_s9 + $0x84] sm:$0xff]  }
  0x42   : > { %v964_v22 = vrot.slane %v963_v14, 4  ;;  %v977_v23 = vor.u32 %v976_v15, %v973_v9  ;;  %v992_v24 = vrot.slane %v990_v16, 5  ;;  %v995_v25 = vshrl.u32 %v796_v2, 16  ;;  %v1590_v13 = vld [vmem:[%s3151_s9 + $0x28] sm:$0xf] }
  0x43   : > { %2717 = vmatprep.mubr.msk.bf16.mxu0 %vm501_vm0, %v2526_v17  ;;  %v987_v26 = vor.u32 %v986_v20, %v982_v19  ;;  %v998_v27 = vshll.u32 %v796_v2, 16  ;;  %v1004_v28 = vshll.u32 %v797_v7, 16  ;;  %v1008_v30 = vshrl.u32 %v797_v7, 16  ;;  %v3035_v7 = vld [vmem:[%s3151_s9 + $0x90] sm:$0xff]   ;;  %v1591_v17 = vld [vmem:[%s3151_s9 + $0x2c] sm:$0x1] }
  0x44   : > { %2686 = vmatmul.mubr.msk.bf16.gmra.mrb[12].mxu1 %vm501_vm0, %v3029_v59  ;;  %v969_v32 = vsel %vm3177_vm3, %v964_v22, %v968_v5  ;;  %v978_v33 = vrot.slane %v977_v23, 4  ;;  %v997_v34 = vrot.slane %v995_v25, 4  ;;  %v1014_v35 = vshll.u32 %v798_v12, 16  ;;  %v1587_v5 = vld [vmem:[%s3151_s9 + $0x1c] sm:$0xf] }
  0x45   : > { %2689 = vmatprep.mubr.msk.bf16.mxu1 %vm501_vm0, %v3031_v21  ;;  %v2527_v38 = vcombine.low %v959_v18, %v969_v32  ;;  %v988_v39 = vrot.slane %v987_v26, 4  ;;  %v1000_v40 = vrot.slane %v998_v27, 5  ;;  %v1006_v41 = vrot.slane %v1004_v28, 5  ;;  %v1589_v12 = vld [vmem:[%s3151_s9 + $0x24] sm:$0xe] }
  0x46   : > { %v983_v44 = vsel %vm3177_vm3, %v978_v33, %v982_v19  ;;  %v1010_v45 = vrot.slane %v1008_v30, 4  ;;  %v2556_v47 = vrot.slane %v1580_v31, 9  ;;  %v1681_v51 = vrot.slane %v1581_v37, 5  ;;  %v1592_v22 = vld [vmem:[%s3151_s9 + $0x30] sm:$0xe] }
  0x47   : > { %2718 = vmatmul.mubr.msk.bf16.gmra.mrb[8].mxu0 %vm501_vm0, %v2527_v38  ;;  %v993_v49 = vsel %vm3177_vm3, %v988_v39, %v992_v24  ;;  %v1001_v50 = vor.u32 %v1000_v40, %v997_v34  ;;  %v1684_v52 = vrot.slane %v1582_v42, 5  ;;  %v1016_v57 = vrot.slane %v1014_v35, 5  ;;  %v1593_v26 = vld [vmem:[%s3151_s9 + $0x34] sm:$0xf]  ;;  %v1594_v27 = vld [vmem:[%s3151_s9 + $0x38] sm:$0x1] }
  0x48   : > { %v2528_v55 = vcombine.low %v983_v44, %v993_v49  ;;  %v1011_v56 = vor.u32 %v1010_v45, %v1006_v41  ;;  %v1688_v58 = vrot.slane %v1584_v53, 5  ;;  %v1682_v60 = vsel %vm3251_vm6, %v2556_v47, %v1681_v51  ;;  %v1595_v34 = vld [vmem:[%s3151_s9 + $0x3c] sm:$0xe]  ;;  %v1596_v35 = vld [vmem:[%s3151_s9 + $0x40] sm:$0xf] }
  0x49   : > { %v1002_v59 = vrot.slane %v1001_v50, 4  ;;  %v1683_v61 = vrot.slane %v1681_v51, 4  ;;  %v2557_v3 = vrot.slane %v1583_v48, 9  ;;  %v1691_v4 = vrot.slane %v1585_v54, 5  ;;  %v3036_v45 = vld [vmem:[%s3151_s9 + $0x9c] sm:$0xff]  }
  0x4a   : > { %2721 = vmatprep.mubr.msk.bf16.mxu0 %vm501_vm0, %v2528_v55  ;;  %v1012_v62 = vrot.slane %v1011_v56, 4  ;;  %v1690_v10 = vrot.slane %v1688_v58, 4  ;;  %v1695_v11 = vrot.slane %v1587_v5, 5  ;;  %v2558_v15 = vrot.slane %v1586_v0, 9  ;;  %v1598_v49 = vld [vmem:[%s3151_s9 + $0x48] sm:$0xe] }
  0x4b   : > { %v1007_v1 = vsel %vm3177_vm3, %v1002_v59, %v1006_v41  ;;  %v1685_v2 = vsel %vm3251_vm6, %v1683_v61, %v1684_v52  ;;  %v1698_v16 = vrot.slane %v1588_v6, 5  ;;  %v2559_v19 = vrot.slane %v1589_v12, 9  ;;  %v3037_v52 = vld [vmem:[%s3151_s9 + $0xa8] sm:$0xff]   ;;  %v1600_v54 = vld [vmem:[%s3151_s9 + $0x50] sm:$0x1] }
  0x4c   : > { %2690 = vmatmul.mubr.msk.bf16.gmra.mrb[16].mxu1 %vm501_vm0, %v3032_v36  ;;  %v1017_v8 = vsel %vm3177_vm3, %v1012_v62, %v1016_v57  ;;  %v2576_v9 = vcombine.low %v1682_v60, %v1685_v2  ;;  %v1697_v18 = vrot.slane %v1695_v11, 4  ;;  %v1702_v20 = vrot.slane %v1590_v13, 5  ;;  %v1597_v36 = vld [vmem:[%s3151_s9 + $0x44] sm:$0x1]  ;;  %v1599_v53 = vld [vmem:[%s3151_s9 + $0x4c] sm:$0xf] }
  0x4d   : > { %2693 = vmatprep.mubr.msk.bf16.mxu1 %vm501_vm0, %v3033_v43  ;;  %v2529_v14 = vcombine.low %v1007_v1, %v1017_v8  ;;  %v1705_v21 = vrot.slane %v1591_v17, 5  ;;  %v1689_v23 = vsel %vm3251_vm6, %v2557_v3, %v1688_v58  ;;  %v1692_v24 = vsel %vm3251_vm6, %v1690_v10, %v1691_v4  ;;  %v1601_v59 = vld [vmem:[%s3151_s9 + $0x54] sm:$0xe]  ;;  %v1602_v60 = vld [vmem:[%s3151_s9 + $0x58] sm:$0xf] }
  0x4e   : > { %v1704_v25 = vrot.slane %v1702_v20, 4  ;;  %v2560_v28 = vrot.slane %v1592_v22, 9  ;;  %v1696_v30 = vsel %vm3251_vm6, %v2558_v15, %v1695_v11  ;;  %v1699_v31 = vsel %vm3251_vm6, %v1697_v18, %v1698_v16  ;;  %v799_v2 = vld [vmem:[%s3151_s9 + $0x60] sm:$0xf]  ;;  %v801_v8 = vld [vmem:[%s3151_s9 + $0x68] sm:$0x1] }
  0x4f   : > { %2722 = vmatmul.mubr.msk.bf16.gmra.mrb[12].mxu0 %vm501_vm0, %v2529_v14  ;;  %v1709_v32 = vrot.slane %v1593_v26, 5  ;;  %v1712_v33 = vrot.slane %v1594_v27, 5  ;;  %v2561_v37 = vrot.slane %v1595_v34, 9  ;;  %v1716_v38 = vrot.slane %v1596_v35, 5  ;;  %v802_v13 = vld [vmem:[%s3151_s9 + $0x6c] sm:$0xf] }
  0x50   : > { %2745 = vmatprep.mubr.msk.bf16.mxu0 %vm501_vm0, %v2576_v9  ;;  %v2577_v39 = vcombine.low %v1689_v23, %v1692_v24  ;;  %v3300_v40 = vsel %vm3251_vm6, %v2559_v19, %v1702_v20  ;;  %v1719_v42 = vrot.slane %v1597_v36, 5  ;;  %v2578_v43 = vcombine.low %v1696_v30, %v1699_v31  ;;  %v803_v18 = vld [vmem:[%s3151_s9 + $0x70] sm:$0xf]  ;;  %v804_v23 = vld [vmem:[%s3151_s9 + $0x74] sm:$0x1] }
  0x51   : > { %v1711_v41 = vrot.slane %v1709_v32, 4  ;;  %v3304_v44 = vsel %vm3251_vm6, %v1704_v25, %v1705_v21  ;;  %v3309_v47 = vsel %vm3251_vm6, %v2560_v28, %v1709_v32  ;;  %v1718_v48 = vrot.slane %v1716_v38, 4  ;;  %v805_v24 = vld [vmem:[%s3151_s9 + $0x78] sm:$0xf] }
  0x52   : > { %v3318_v51 = vsel %vm3251_vm6, %v2561_v37, %v1716_v38  ;;  %v2562_v55 = vrot.slane %v1598_v49, 9  ;;  %v1723_v57 = vrot.slane %v1599_v53, 5  ;;  %v1726_v58 = vrot.slane %v1600_v54, 5  ;;  %v3038_v25 = vld [vmem:[%s3151_s9 + $0xb4] sm:$0xff]   ;;  %v806_v38 = vld [vmem:[%s3151_s9 + $0x7c] sm:$0xf] }
  0x53   : > { %v3314_v50 = vsel %vm3251_vm6, %v1711_v41, %v1712_v33  ;;  %v3325_v56 = vsel %vm3251_vm6, %v1718_v48, %v1719_v42  ;;  %v2579_v61 = vcombine.low %v3300_v40, %v3304_v44  ;;  %v2563_v0 = vrot.slane %v1601_v59, 9  ;;  %v807_v44 = vld [vmem:[%s3151_s9 + $0x80] sm:$0x1] }
  0x54   : > { %2694 = vmatmul.mubr.msk.bf16.gmra.mrb[20].mxu1 %vm501_vm0, %v3034_v63  ;;  %v2580_v62 = vcombine.low %v3309_v47, %v3314_v50  ;;  %v1603_v63 = vld [vmem:[%s3151_s9 + $0x5c] sm:$0x1]  ;;  %v1730_v1 = vrot.slane %v1602_v60, 5  ;;  %v2581_v3 = vcombine.low %v3318_v51, %v3325_v56  ;;  %v3342_v4 = vsel %vm3251_vm6, %v2562_v55, %v1723_v57  ;;  %v1604_v55 = vld [vmem:[%s3151_s9 + $0x60] sm:$0xe] }
  0x55   : > { %2697 = vmatprep.mubr.msk.bf16.mxu1 %vm501_vm0, %v3035_v7  ;;  %v1725_v5 = vrot.slane %v1723_v57, 4  ;;  %v1733_v6 = vrot.slane %v1603_v63, 5  ;;  %v800_v7 = vld [vmem:[%s3151_s9 + $0x64] sm:$0xf]  ;;  %v1019_v11 = vshrl.u32 %v799_v2, 16  ;;  %v1022_v12 = vshll.u32 %v799_v2, 16 }
  0x56   : > { %v3349_v9 = vsel %vm3251_vm6, %v2563_v0, %v1730_v1  ;;  %v1732_v10 = vrot.slane %v1730_v1, 4  ;;  %v1028_v15 = vshll.u32 %v800_v7, 16  ;;  %v1032_v16 = vshrl.u32 %v800_v7, 16 }
  0x57   : > { %2746 = vmatmul.mubr.msk.bf16.vlgmr.msra.gmra.mrb[0].mxu0 %vm501_vm0, %v2577_v39  ;;  %v3354_v14 = vsel %vm3251_vm6, %v1725_v5, %v1726_v58  ;;  %v1038_v17 = vshll.u32 %v801_v8, 16  ;;  %v1021_v21 = vrot.slane %v1019_v11, 4  ;;  %v1024_v22 = vrot.slane %v1022_v12, 5  ;;  %v808_v5 = vld [vmem:[%s3151_s9 + $0x84] sm:$0xf] }
  0x58   : > { %2749 = vmatprep.mubr.msk.bf16.mxu0 %vm501_vm0, %v2578_v43  ;;  %v2582_v19 = vcombine.low %v3342_v4, %v3354_v14  ;;  %v3361_v20 = vsel %vm3251_vm6, %v1732_v10, %v1733_v6  ;;  %v1030_v27 = vrot.slane %v1028_v15, 5  ;;  %v1034_v28 = vrot.slane %v1032_v16, 4  ;;  %v809_v16 = vld [vmem:[%s3151_s9 + $0x88] sm:$0xf]  ;;  %v1609_v4 = vld [vmem:[%s3151_s9 + $0x74] sm:$0x1] }
  0x59   : > { %v2583_v26 = vcombine.low %v3349_v9, %v3361_v20  ;;  %v1040_v30 = vrot.slane %v1038_v17, 5  ;;  %v1025_v31 = vor.u32 %v1024_v22, %v1021_v21  ;;  %v1043_v32 = vshrl.u32 %v802_v13, 16  ;;  %v810_v21 = vld [vmem:[%s3151_s9 + $0x8c] sm:$0x1]  ;;  %v811_v14 = vld [vmem:[%s3151_s9 + $0x90] sm:$0xf] }
  0x5a   : > { %v1046_v33 = vshll.u32 %v802_v13, 16  ;;  %v1052_v34 = vshll.u32 %v803_v18, 16  ;;  %v1035_v35 = vor.u32 %v1034_v28, %v1030_v27  ;;  %v1056_v36 = vshrl.u32 %v803_v18, 16 }
  0x5b   : > { %v1062_v37 = vshll.u32 %v804_v23, 16  ;;  %v1067_v39 = vshrl.u32 %v805_v24, 16  ;;  %v1026_v40 = vrot.slane %v1025_v31, 4  ;;  %v1045_v41 = vrot.slane %v1043_v32, 4 }
  0x5c   : > { %2698 = vmatmul.mubr.msk.bf16.gmra.mrb[24].mxu1 %vm501_vm0, %v3036_v45  ;;  %v1048_v42 = vrot.slane %v1046_v33, 5  ;;  %v1054_v43 = vrot.slane %v1052_v34, 5  ;;  %v1036_v45 = vrot.slane %v1035_v35, 4  ;;  %v1058_v47 = vrot.slane %v1056_v36, 4 }
  0x5d   : > { %2701 = vmatprep.mubr.msk.bf16.mxu1 %vm501_vm0, %v3037_v52  ;;  %v1064_v48 = vrot.slane %v1062_v37, 5  ;;  %v1069_v49 = vrot.slane %v1067_v39, 4  ;;  %v1031_v50 = vsel %vm3177_vm3, %v1026_v40, %v1030_v27  ;;  %v1070_v53 = vshll.u32 %v805_v24, 16  ;;  %v812_v40 = vld [vmem:[%s3151_s9 + $0x94] sm:$0xf] }
  0x5e   : > { %v1049_v52 = vor.u32 %v1048_v42, %v1045_v41  ;;  %v1076_v54 = vshll.u32 %v806_v38, 16  ;;  %v1041_v57 = vsel %vm3177_vm3, %v1036_v45, %v1040_v30  ;;  %v1059_v58 = vor.u32 %v1058_v47, %v1054_v43  ;;  %v1607_v30 = vld [vmem:[%s3151_s9 + $0x6c] sm:$0xe]  ;;  %v813_v45 = vld [vmem:[%s3151_s9 + $0x98] sm:$0x1] }
  0x5f   : > { %2750 = vmatmul.mubr.msk.bf16.gmra.mrb[4].mxu0 %vm501_vm0, %v2579_v61  ;;  %v1080_v59 = vshrl.u32 %v806_v38, 16  ;;  %v1086_v60 = vshll.u32 %v807_v44, 16  ;;  %v1605_v61 = vld [vmem:[%s3151_s9 + $0x64] sm:$0xf]  ;;  %v2530_v63 = vcombine.low %v1031_v50, %v1041_v57  ;;  %v1072_v1 = vrot.slane %v1070_v53, 5 }
  0x60   : > { %2753 = vmatprep.mubr.msk.bf16.mxu0 %vm501_vm0, %v2580_v62  ;;  %v1606_v62 = vld [vmem:[%s3151_s9 + $0x68] sm:$0x1]  ;;  %v1050_v0 = vrot.slane %v1049_v52, 4  ;;  %v1078_v2 = vrot.slane %v1076_v54, 5  ;;  %v1060_v6 = vrot.slane %v1059_v58, 4  ;;  %v2564_v10 = vrot.slane %v1604_v55, 9 }
  0x61   : > { %v1082_v7 = vrot.slane %v1080_v59, 4  ;;  %v1088_v8 = vrot.slane %v1086_v60, 5  ;;  %v1073_v12 = vor.u32 %v1072_v1, %v1069_v49  ;;  %v1737_v13 = vrot.slane %v1605_v61, 5  ;;  %v1610_v52 = vld [vmem:[%s3151_s9 + $0x78] sm:$0xe] }
  0x62   : > { %v1055_v11 = vsel %vm3177_vm3, %v1050_v0, %v1054_v43  ;;  %v1740_v15 = vrot.slane %v1606_v62, 5  ;;  %v1065_v17 = vsel %vm3177_vm3, %v1060_v6, %v1064_v48  ;;  %v1091_v22 = vshrl.u32 %v808_v5, 16  ;;  %v1611_v58 = vld [vmem:[%s3151_s9 + $0x7c] sm:$0xf] }
  0x63   : > { %v1083_v18 = vor.u32 %v1082_v7, %v1078_v2  ;;  %v1094_v23 = vshll.u32 %v808_v5, 16  ;;  %v2531_v24 = vcombine.low %v1055_v11, %v1065_v17  ;;  %v1738_v27 = vsel %vm3251_vm6, %v2564_v10, %v1737_v13  ;;  %v1612_v5 = vld [vmem:[%s3151_s9 + $0x80] sm:$0x1]  ;;  %v814_v11 = vld [vmem:[%s3151_s9 + $0x9c] sm:$0xf] }
  0x64   : > { %2702 = vmatmul.mubr.msk.bf16.gmra.mrb[28].mxu1 %vm501_vm0, %v3038_v25  ;;  %v1074_v25 = vrot.slane %v1073_v12, 4  ;;  %v1739_v28 = vrot.slane %v1737_v13, 4  ;;  %v1093_v32 = vrot.slane %v1091_v22, 4  ;;  %v1100_v56 = vshll.u32 %v809_v16, 16  ;;  %v815_v13 = vld [vmem:[%s3151_s9 + $0xa0] sm:$0xf] }
  0x65   : > { %2725 = vmatprep.mubr.msk.bf16.mxu1 %vm501_vm0, %v2530_v63  ;;  %v1084_v31 = vrot.slane %v1083_v18, 4  ;;  %v1096_v51 = vrot.slane %v1094_v23, 5  ;;  %v1104_v35 = vshrl.u32 %v809_v16, 16  ;;  %v1110_v36 = vshll.u32 %v810_v21, 16 }
  0x66   : > { %v1079_v33 = vsel %vm3177_vm3, %v1074_v25, %v1078_v2  ;;  %v1741_v34 = vsel %vm3251_vm6, %v1739_v28, %v1740_v15  ;;  %v1102_v39 = vrot.slane %v1100_v56, 5  ;;  %v2565_v44 = vrot.slane %v1607_v30, 9  ;;  %v816_v15 = vld [vmem:[%s3151_s9 + $0xa4] sm:$0x1] }
  0x67   : > { %2754 = vmatmul.mubr.msk.bf16.gmra.mrb[8].mxu0 %vm501_vm0, %v2581_v3  ;;  %v1608_v3 = vld [vmem:[%s3151_s9 + $0x70] sm:$0xf]  ;;  %v2584_v37 = vcombine.low %v1738_v27, %v1741_v34  ;;  %v1097_v38 = vor.u32 %v1096_v51, %v1093_v32  ;;  %v1106_v42 = vrot.slane %v1104_v35, 4  ;;  %v1112_v43 = vrot.slane %v1110_v36, 5  ;;  %v1613_v27 = vld [vmem:[%s3151_s9 + $0x84] sm:$0xe] }
  0x68   : > { %2757 = vmatprep.mubr.msk.bf16.mxu0 %vm501_vm0, %v2582_v19  ;;  %v1089_v19 = vsel %vm3177_vm3, %v1084_v31, %v1088_v8  ;;  %v1744_v48 = vrot.slane %v1608_v3, 5  ;;  %v1747_v49 = vrot.slane %v1609_v4, 5  ;;  %v1115_v50 = vshrl.u32 %v811_v14, 16  ;;  %v1614_v51 = vld [vmem:[%s3151_s9 + $0x88] sm:$0xf] }
  0x69   : > { %v2532_v41 = vcombine.low %v1079_v33, %v1089_v19  ;;  %v1098_v47 = vrot.slane %v1097_v38, 4  ;;  %v1107_v53 = vor.u32 %v1106_v42, %v1102_v39  ;;  %v1118_v54 = vshll.u32 %v811_v14, 16  ;;  %v1615_v35 = vld [vmem:[%s3151_s9 + $0x8c] sm:$0x1]  ;;  %v817_v36 = vld [vmem:[%s3151_s9 + $0xa8] sm:$0xf] }
  0x6a   : > { %v1124_v55 = vshll.u32 %v812_v40, 16  ;;  %v1128_v57 = vshrl.u32 %v812_v40, 16  ;;  %v1745_v60 = vsel %vm3251_vm6, %v2565_v44, %v1744_v48  ;;  %v1746_v61 = vrot.slane %v1744_v48, 4  ;;  %v818_v38 = vld [vmem:[%s3151_s9 + $0xac] sm:$0xf] }
  0x6b   : > { %v1103_v59 = vsel %vm3177_vm3, %v1098_v47, %v1102_v39  ;;  %v1117_v62 = vrot.slane %v1115_v50, 4  ;;  %v1108_v63 = vrot.slane %v1107_v53, 4  ;;  %v1120_v0 = vrot.slane %v1118_v54, 5  ;;  %v1616_v54 = vld [vmem:[%s3151_s9 + $0x90] sm:$0xe] }
  0x6c   : > { %2726 = vmatmul.mubr.msk.bf16.vlgmr.msra.gmra.mrb[16].mxu1 %vm501_vm0, %v2531_v24  ;;  %v1126_v1 = vrot.slane %v1124_v55, 5  ;;  %v1130_v2 = vrot.slane %v1128_v57, 4  ;;  %v1748_v6 = vsel %vm3251_vm6, %v1746_v61, %v1747_v49  ;;  %v1134_v7 = vshll.u32 %v813_v45, 16  ;;  %v819_v45 = vld [vmem:[%s3151_s9 + $0xb0] sm:$0x1] }
  0x6d   : > { %2729 = vmatprep.mubr.msk.bf16.mxu1 %vm501_vm0, %v2532_v41  ;;  %v2566_v8 = vrot.slane %v1610_v52, 9  ;;  %v1751_v10 = vrot.slane %v1611_v58, 5  ;;  %v1113_v9 = vsel %vm3177_vm3, %v1108_v63, %v1112_v43  ;;  %v2585_v20 = vcombine.low %v1745_v60, %v1748_v6  ;;  %v1617_v60 = vld [vmem:[%s3151_s9 + $0x94] sm:$0xf] }
  0x6e   : > { %v1131_v12 = vor.u32 %v1130_v2, %v1126_v1  ;;  %v2533_v16 = vcombine.low %v1103_v59, %v1113_v9  ;;  %v1136_v17 = vrot.slane %v1134_v7, 5  ;;  %v1754_v24 = vrot.slane %v1612_v5, 5 }
  0x6f   : > { %2758 = vmatmul.mubr.msk.bf16.gmra.mrb[12].mxu0 %vm501_vm0, %v2583_v26  ;;  %v1121_v26 = vor.u32 %v1120_v0, %v1117_v62  ;;  %v1752_v18 = vsel %vm3251_vm6, %v2566_v8, %v1751_v10  ;;  %v1753_v21 = vrot.slane %v1751_v10, 4  ;;  %v1139_v25 = vshrl.u32 %v814_v11, 16  ;;  %v820_v8 = vld [vmem:[%s3151_s9 + $0xb4] sm:$0xf] }
  0x70   : > { %2761 = vmatprep.mubr.msk.bf16.mxu0 %vm501_vm0, %v2584_v37  ;;  %v1132_v23 = vrot.slane %v1131_v12, 4  ;;  %v1142_v28 = vshll.u32 %v814_v11, 16  ;;  %v1148_v30 = vshll.u32 %v815_v13, 16  ;;  %v1152_v31 = vshrl.u32 %v815_v13, 16 }
  0x71   : > { %v1122_v22 = vrot.slane %v1121_v26, 4  ;;  %v1158_v32 = vshll.u32 %v816_v15, 16  ;;  %v1755_v33 = vsel %vm3251_vm6, %v1753_v21, %v1754_v24  ;;  %v1141_v34 = vrot.slane %v1139_v25, 4  ;;  %v821_v26 = vld [vmem:[%s3151_s9 + $0xb8] sm:$0xf] }
  0x72   : > { %v1137_v3 = vsel %vm3177_vm3, %v1132_v23, %v1136_v17  ;;  %v2586_v14 = vcombine.low %v1752_v18, %v1755_v33  ;;  %v1144_v19 = vrot.slane %v1142_v28, 5  ;;  %v1150_v37 = vrot.slane %v1148_v30, 5  ;;  %v822_v17 = vld [vmem:[%s3151_s9 + $0xbc] sm:$0x1]  ;;  %v1619_v18 = vld [vmem:[%s3151_s9 + $0x9c] sm:$0xe] }
  0x73   : > { %v1127_v56 = vsel %vm3177_vm3, %v1122_v22, %v1126_v1  ;;  %v1154_v39 = vrot.slane %v1152_v31, 4  ;;  %v1160_v40 = vrot.slane %v1158_v32, 5  ;;  %v2567_v41 = vrot.slane %v1613_v27, 9  ;;  %v1618_v1 = vld [vmem:[%s3151_s9 + $0x98] sm:$0x1] }
  0x74   : > { %2730 = vmatmul.mubr.msk.bf16.gmra.mrb[20].mxu1 %vm501_vm0, %v2533_v16  ;;  %v2534_v4 = vcombine.low %v1127_v56, %v1137_v3  ;;  %v1758_v42 = vrot.slane %v1614_v51, 5  ;;  %v1145_v43 = vor.u32 %v1144_v19, %v1141_v34  ;;  %v1761_v44 = vrot.slane %v1615_v35, 5  ;;  %v1620_v25 = vld [vmem:[%s3151_s9 + $0xa0] sm:$0xf]  ;;  %v1621_v32 = vld [vmem:[%s3151_s9 + $0xa4] sm:$0x1] }
  0x75   : > { %v1163_v47 = vshrl.u32 %v817_v36, 16  ;;  %v1166_v48 = vshll.u32 %v817_v36, 16  ;;  %v1155_v49 = vor.u32 %v1154_v39, %v1150_v37  ;;  %v1172_v53 = vshll.u32 %v818_v38, 16  ;;  %v1622_v34 = vld [vmem:[%s3151_s9 + $0xa8] sm:$0xe] }
  0x76   : > { %2733 = vmatprep.mubr.msk.bf16.mxu1 %vm501_vm0, %v2534_v4  ;;  %v1759_v50 = vsel %vm3251_vm6, %v2567_v41, %v1758_v42  ;;  %v1760_v52 = vrot.slane %v1758_v42, 4  ;;  %v1146_v55 = vrot.slane %v1145_v43, 4  ;;  %v1176_v59 = vshrl.u32 %v818_v38, 16  ;;  %v1623_v19 = vld [vmem:[%s3151_s9 + $0xac] sm:$0xf] }
  0x77   : > { %2762 = vmatmul.mubr.msk.bf16.gmra.mrb[16].mxu0 %vm501_vm0, %v2585_v20  ;;  %v1165_v57 = vrot.slane %v1163_v47, 4  ;;  %v1168_v58 = vrot.slane %v1166_v48, 5  ;;  %v1156_v61 = vrot.slane %v1155_v49, 4  ;;  %v1174_v63 = vrot.slane %v1172_v53, 5  ;;  %v1626_v42 = vld [vmem:[%s3151_s9 + $0xb8] sm:$0xf] }
  0x78   : > { %2765 = vmatprep.mubr.msk.bf16.mxu0 %vm501_vm0, %v2586_v14  ;;  %v1762_v62 = vsel %vm3251_vm6, %v1760_v52, %v1761_v44  ;;  %v1182_v0 = vshll.u32 %v819_v45, 16  ;;  %v1151_v2 = vsel %vm3177_vm3, %v1146_v55, %v1150_v37  ;;  %v1178_v7 = vrot.slane %v1176_v59, 4  ;;  %v1624_v37 = vld [vmem:[%s3151_s9 + $0xb0] sm:$0x1]  ;;  %v1625_v48 = vld [vmem:[%s3151_s9 + $0xb4] sm:$0xe] }
  0x79   : > { %v2587_v5 = vcombine.low %v1759_v50, %v1762_v62  ;;  %v1169_v6 = vor.u32 %v1168_v58, %v1165_v57  ;;  %v1161_v10 = vsel %vm3177_vm3, %v1156_v61, %v1160_v40  ;;  %v2568_v9 = vrot.slane %v1616_v54, 9  ;;  %v1627_v53 = vld [vmem:[%s3151_s9 + $0xbc] sm:$0x1] }
  0x7a   : > { %v1184_v11 = vrot.slane %v1182_v0, 5  ;;  %v1765_v20 = vrot.slane %v1617_v60, 5  ;;  %v2535_v12 = vcombine.low %v1151_v2, %v1161_v10  ;;  %v1179_v15 = vor.u32 %v1178_v7, %v1174_v63 }
  0x7b   : > { %v1170_v13 = vrot.slane %v1169_v6, 4  ;;  %v1768_v16 = vrot.slane %v1618_v1, 5  ;;  %v1187_v23 = vshrl.u32 %v820_v8, 16  ;;  %v1190_v24 = vshll.u32 %v820_v8, 16 }
  0x7c   : > { %v1766_v21 = vsel %vm3251_vm6, %v2568_v9, %v1765_v20  ;;  %v1767_v22 = vrot.slane %v1765_v20, 4  ;;  %2734 = vmatmul.mubr.msk.bf16.gmra.mrb[24].mxu1 %vm501_vm0, %v2535_v12  ;;  %v1180_v28 = vrot.slane %v1179_v15, 4  ;;  %v1196_v30 = vshll.u32 %v821_v26, 16 }
  0x7d   : > { %v1175_v27 = vsel %vm3177_vm3, %v1170_v13, %v1174_v63  ;;  %v1200_v31 = vshrl.u32 %v821_v26, 16  ;;  %v1189_v56 = vrot.slane %v1187_v23, 4  ;;  %v1192_v3 = vrot.slane %v1190_v24, 5 }
  0x7e   : > { %v1769_v51 = vsel %vm3251_vm6, %v1767_v22, %v1768_v16  ;;  %v1206_v33 = vshll.u32 %v822_v17, 16  ;;  %v1185_v35 = vsel %vm3177_vm3, %v1180_v28, %v1184_v11  ;;  %v1198_v4 = vrot.slane %v1196_v30, 5  ;;  %v375_v28 = vld [vmem:[#allocation2 + $0x10] sm:$0xff]  ;;  %v373_v30 = vld [vmem:[#allocation2] sm:$0xff] }
  0x7f   : > { %2766 = vmatmul.mubr.msk.bf16.gmra.mrb[20].mxu0 %vm501_vm0, %v2587_v5  ;;  %v2588_v36 = vcombine.low %v1766_v21, %v1769_v51  ;;  %v1202_v14 = vrot.slane %v1200_v31, 4  ;;  %v2536_v38 = vcombine.low %v1175_v27, %v1185_v35  ;;  %v1193_v39 = vor.u32 %v1192_v3, %v1189_v56  ;;  %v376_v31 = vld [vmem:[#allocation2 + $0x18] sm:$0xff]  ;;  %v374_v51 = vld [vmem:[#allocation2 + $0x8] sm:$0xff] }
  0x80   : > { %v1208_v40 = vrot.slane %v1206_v33, 5  ;;  %v2569_v41 = vrot.slane %v1619_v18, 9  ;;  %v1772_v44 = vrot.slane %v1620_v25, 5  ;;  %v1775_v45 = vrot.slane %v1621_v32, 5 }
  0x81   : > { %2769 = vmatprep.mubr.msk.bf16.mxu0 %vm501_vm0, %v2588_v36  ;;  %v1203_v43 = vor.u32 %v1202_v14, %v1198_v4  ;;  %v2570_v47 = vrot.slane %v1622_v34, 9  ;;  %2737 = vmatprep.mubr.msk.bf16.mxu1 %vm501_vm0, %v2536_v38  ;;  %v1194_v49 = vrot.slane %v1193_v39, 4  ;;  %v1779_v50 = vrot.slane %v1623_v19, 5  ;;  %v379_v38 = vld [vmem:[#allocation2 + $0x30] sm:$0xff] }
  0x82   : > { %v1782_v52 = vrot.slane %v1624_v37, 5  ;;  %v1773_v55 = vsel %vm3251_vm6, %v2569_v41, %v1772_v44  ;;  %v1774_v57 = vrot.slane %v1772_v44, 4  ;;  %v1786_v58 = vrot.slane %v1626_v42, 5  ;;  %v380_v41 = vld [vmem:[#allocation2 + $0x38] sm:$0xff] }
  0x83   : > { %v1204_v54 = vrot.slane %v1203_v43, 4  ;;  %v1199_v59 = vsel %vm3177_vm3, %v1194_v49, %v1198_v4  ;;  %v1780_v60 = vsel %vm3251_vm6, %v2570_v47, %v1779_v50  ;;  %v1781_v61 = vrot.slane %v1779_v50, 4  ;;  %v378_v43 = vld [vmem:[#allocation2 + $0x28] sm:$0xff] }
  0x84   : > { %v2571_v62 = vrot.slane %v1625_v48, 9  ;;  %v1776_v0 = vsel %vm3251_vm6, %v1774_v57, %v1775_v45  ;;  %v1788_v1 = vrot.slane %v1786_v58, 4  ;;  %v1789_v2 = vrot.slane %v1627_v53, 5  ;;  %v383_v57 = vld [vmem:[#allocation2 + $0x50] sm:$0xff] }
  0x85   : > { %v1209_v63 = vsel %vm3177_vm3, %v1204_v54, %v1208_v40  ;;  %v2589_v6 = vcombine.low %v1773_v55, %v1776_v0  ;;  %v1783_v7 = vsel %vm3251_vm6, %v1781_v61, %v1782_v52  ;;  %v377_v40 = vld [vmem:[#allocation2 + $0x20] sm:$0xff] }
  0x86   : > { %v2537_v5 = vcombine.low %v1199_v59, %v1209_v63  ;;  %v2590_v8 = vcombine.low %v1780_v60, %v1783_v7  ;;  %v1787_v29 = vsel %vm3251_vm6, %v2571_v62, %v1786_v58  ;;  %v1790_v10 = vsel %vm3251_vm6, %v1788_v1, %v1789_v2  ;;  %v381_v59 = vld [vmem:[#allocation2 + $0x40] sm:$0xff]  ;;  %v384_v60 = vld [vmem:[#allocation2 + $0x58] sm:$0xff]  ;;  %v382_v62 = vld [vmem:[#allocation2 + $0x48] sm:$0xff] }
  0x87   : > { %2770 = vmatmul.mubr.msk.bf16.gmra.mrb[24].mxu0 %vm501_vm0, %v2589_v6  ;;  %v2591_v11 = vcombine.low %v1787_v29, %v1790_v10 }
  0x88   : > { %2738 = vmatmul.mubr.msk.bf16.gmra.mrb[28].mxu1 %vm501_vm0, %v2537_v5  ;;  %2773 = vmatprep.mubr.msk.bf16.mxu0 %vm501_vm0, %v2590_v8 }
  0x8f   : > { %2774 = vmatmul.mubr.msk.bf16.gmra.mrb[28].mxu0 %vm501_vm0, %v2591_v11 }
  0xff   : > { %v2675_v9 = vpop.f32.mrb[0].mxu1 }
 0x100   : > { %v584_v20 = vpop.f32.mrb[1].mxu1  ;;  %v713_v32 = vadd.f32 %v2675_v9, %v375_v28 }
 0x101   : > { %v2676_v26 = vpop.f32.mrb[2].mxu1  ;;  %v711_v56 = vadd.f32 %v584_v20, %v373_v30  ;;  %v387_v20 = vld [vmem:[#allocation2 + $0x70] sm:$0xff] }
 0x102   : > { %v587_v12 = vpop.f32.mrb[3].mxu1  ;;  %v714_v33 = vadd.f32 %v2676_v26, %v376_v31 }
 0x103   : > { %v712_v36 = vadd.f32 %v587_v12, %v374_v51 }
 0x107   : > { %v2679_v13 = vpop.f32.mrb[4].mxu1 }
 0x108   : > { %v600_v15 = vpop.f32.mrb[5].mxu1  ;;  %v717_v42 = vadd.f32 %v2679_v13, %v379_v38  ;;  %v385_v13 = vld [vmem:[#allocation2 + $0x60] sm:$0xff] }
 0x109   : > { %v2680_v16 = vpop.f32.mrb[6].mxu1  ;;  %v715_v44 = vadd.f32 %v600_v15, %v377_v40 }
 0x10a   : > { %v603_v17 = vpop.f32.mrb[7].mxu1  ;;  %v718_v47 = vadd.f32 %v2680_v16, %v380_v41  ;;  %v388_v16 = vld [vmem:[#allocation2 + $0x78] sm:$0xff] }
 0x10b   : > { %v716_v50 = vadd.f32 %v603_v17, %v378_v43 }
 0x10f   : > { %v2683_v18 = vpop.f32.mrb[8].mxu1 }
 0x110   : > { %v616_v21 = vpop.f32.mrb[9].mxu1  ;;  %v721_v61 = vadd.f32 %v2683_v18, %v383_v57  ;;  %v386_v18 = vld [vmem:[#allocation2 + $0x68] sm:$0xff] }
 0x111   : > { %v2684_v22 = vpop.f32.mrb[10].mxu1  ;;  %v719_v63 = vadd.f32 %v616_v21, %v381_v59 }
 0x112   : > { %v619_v23 = vpop.f32.mrb[11].mxu1  ;;  %v722_v1 = vadd.f32 %v2684_v22, %v384_v60 }
 0x113   : > { %v720_v6 = vadd.f32 %v619_v23, %v382_v62 }
 0x117   : > { %v3504_v24 = vpop.f32.mrb[12].mxu1 }
 0x118   : > { %v3506_v25 = vpop.f32.mrb[13].mxu1  ;;  %v725_v17 = vadd.f32 %v3504_v24, %v387_v20  ;;  %v392_v24 = vld [vmem:[#allocation2 + $0x98] sm:$0xff] }
 0x119   : > { %v3508_v46 = vpop.f32.mrb[14].mxu1  ;;  %v723_v21 = vadd.f32 %v3506_v25, %v385_v13  ;;  %v390_v25 = vld [vmem:[#allocation2 + $0x88] sm:$0xff] }
 0x11a   : > { %v3510_v27 = vpop.f32.mrb[15].mxu1  ;;  %v726_v23 = vadd.f32 %v3508_v46, %v388_v16 }
 0x11b   : > { %v724_v31 = vadd.f32 %v3510_v27, %v386_v18 }
 0x12a   : > { %v2747_v3 = vpop.f32.mrb[0].mxu0 }
 0x12b   : > { %v2784_v34 = vadd.f32 %v2747_v3, %v713_v32  ;;  %v1970_v35 = vpop.f32.mrb[1].mxu0 }
 0x12c   : > { %v2788_v4 = vadd.f32 %v1970_v35, %v711_v56  ;;  %v2748_v14 = vpop.f32.mrb[2].mxu0  ;;  %v391_v56 = vld [vmem:[#allocation2 + $0x90] sm:$0xff] }
 0x12d   : > { %2131 = vst [vmem:[#allocation2 + $0x10] sm:$0xff] %v2784_v34  ;;  %v2792_v19 = vadd.f32 %v2748_v14, %v714_v33  ;;  %v1973_v37 = vpop.f32.mrb[3].mxu0  ;;  %v389_v34 = vld [vmem:[#allocation2 + $0x80] sm:$0xff] }
 0x12e   : > { %2129 = vst [vmem:[#allocation2] sm:$0xff] %v2788_v4  ;;  %v2796_v39 = vadd.f32 %v1973_v37, %v712_v36 }
 0x12f   : > { %2132 = vst [vmem:[#allocation2 + $0x18] sm:$0xff] %v2792_v19 }
 0x130   : > { %2130 = vst [vmem:[#allocation2 + $0x8] sm:$0xff] %v2796_v39 }
 0x132   : > { %v2751_v45 = vpop.f32.mrb[4].mxu0 }
 0x133   : > { %v2800_v48 = vadd.f32 %v2751_v45, %v717_v42  ;;  %v1986_v49 = vpop.f32.mrb[5].mxu0  ;;  %v395_v42 = vld [vmem:[#allocation2 + $0xb0] sm:$0xff]  ;;  %v393_v45 = vld [vmem:[#allocation2 + $0xa0] sm:$0xff] }
 0x134   : > { %v2804_v52 = vadd.f32 %v1986_v49, %v715_v44  ;;  %v2752_v53 = vpop.f32.mrb[6].mxu0  ;;  %v396_v49 = vld [vmem:[#allocation2 + $0xb8] sm:$0xff] }
 0x135   : > { %2135 = vst [vmem:[#allocation2 + $0x30] sm:$0xff] %v2800_v48  ;;  %v2808_v54 = vadd.f32 %v2752_v53, %v718_v47  ;;  %v1989_v55 = vpop.f32.mrb[7].mxu0  ;;  %v394_v53 = vld [vmem:[#allocation2 + $0xa8] sm:$0xff] }
 0x136   : > { %2133 = vst [vmem:[#allocation2 + $0x20] sm:$0xff] %v2804_v52  ;;  %v2812_v58 = vadd.f32 %v1989_v55, %v716_v50 }
 0x137   : > { %2136 = vst [vmem:[#allocation2 + $0x38] sm:$0xff] %v2808_v54 }
 0x138   : > { %2134 = vst [vmem:[#allocation2 + $0x28] sm:$0xff] %v2812_v58 }
 0x13a   : > { %v2755_v0 = vpop.f32.mrb[8].mxu0 }
 0x13b   : > { %v2816_v2 = vadd.f32 %v2755_v0, %v721_v61  ;;  %v2002_v5 = vpop.f32.mrb[9].mxu0 }
 0x13c   : > { %v2820_v7 = vadd.f32 %v2002_v5, %v719_v63  ;;  %v2756_v8 = vpop.f32.mrb[10].mxu0 }
 0x13d   : > { %2139 = vst [vmem:[#allocation2 + $0x50] sm:$0xff] %v2816_v2  ;;  %v2824_v10 = vadd.f32 %v2756_v8, %v722_v1  ;;  %v2005_v11 = vpop.f32.mrb[11].mxu0  ;;  %v399_v8 = vld [vmem:[#allocation2 + $0xd0] sm:$0xff] }
 0x13e   : > { %2137 = vst [vmem:[#allocation2 + $0x40] sm:$0xff] %v2820_v7  ;;  %v2828_v26 = vadd.f32 %v2005_v11, %v720_v6 }
 0x13f   : > { %v2727_v29 = vpop.f32.mrb[16].mxu1  ;;  %2140 = vst [vmem:[#allocation2 + $0x58] sm:$0xff] %v2824_v10  ;;  %v400_v10 = vld [vmem:[#allocation2 + $0xd8] sm:$0xff] }
 0x140   : > { %v1453_v9 = vpop.f32.mrb[17].mxu1  ;;  %2138 = vst [vmem:[#allocation2 + $0x48] sm:$0xff] %v2828_v26  ;;  %v2847_v36 = vadd.f32 %v2727_v29, %v391_v56  ;;  %v397_v29 = vld [vmem:[#allocation2 + $0xc0] sm:$0xff]  ;;  %v404_v56 = vld [vmem:[#allocation2 + $0xf8] sm:$0xff] }
 0x141   : > { %v2728_v12 = vpop.f32.mrb[18].mxu1  ;;  %v2853_v46 = vadd.f32 %v1453_v9, %v389_v34  ;;  %v398_v9 = vld [vmem:[#allocation2 + $0xc8] sm:$0xff] }
 0x142   : > { %v1456_v15 = vpop.f32.mrb[19].mxu1  ;;  %v2759_v22 = vpop.f32.mrb[12].mxu0  ;;  %v2859_v19 = vadd.f32 %v2728_v12, %v392_v24  ;;  %v402_v34 = vld [vmem:[#allocation2 + $0xe8] sm:$0xff] }
 0x143   : > { %v2832_v28 = vadd.f32 %v2759_v22, %v725_v17  ;;  %v2018_v30 = vpop.f32.mrb[13].mxu0  ;;  %v2865_v27 = vadd.f32 %v1456_v15, %v390_v25 }
 0x144   : > { %v2836_v32 = vadd.f32 %v2018_v30, %v723_v21  ;;  %v2760_v51 = vpop.f32.mrb[14].mxu0  ;;  %v403_v21 = vld [vmem:[#allocation2 + $0xf0] sm:$0xff]  ;;  %v401_v30 = vld [vmem:[#allocation2 + $0xe0] sm:$0xff] }
 0x145   : > { %2143 = vst [vmem:[#allocation2 + $0x70] sm:$0xff] %v2832_v28  ;;  %v2840_v3 = vadd.f32 %v2760_v51, %v726_v23  ;;  %v2021_v33 = vpop.f32.mrb[15].mxu0 }
 0x146   : > { %2141 = vst [vmem:[#allocation2 + $0x60] sm:$0xff] %v2836_v32  ;;  %v2844_v35 = vadd.f32 %v2021_v33, %v724_v31 }
 0x147   : > { %2144 = vst [vmem:[#allocation2 + $0x78] sm:$0xff] %v2840_v3  ;;  %v2731_v4 = vpop.f32.mrb[20].mxu1 }
 0x148   : > { %2142 = vst [vmem:[#allocation2 + $0x68] sm:$0xff] %v2844_v35  ;;  %v1469_v14 = vpop.f32.mrb[21].mxu1  ;;  %v2871_v52 = vadd.f32 %v2731_v4, %v395_v42 }
 0x149   : > { %v2732_v37 = vpop.f32.mrb[22].mxu1  ;;  %v2877_v54 = vadd.f32 %v1469_v14, %v393_v45  ;;  %v2168_v45 = vld [vmem:[#allocation2 + $0x18] sm:$0xff] (!%p2610_p9) }
 0x14a   : > { %v2763_v38 = vpop.f32.mrb[16].mxu0  ;;  %v1472_v39 = vpop.f32.mrb[23].mxu1  ;;  %v2883_v55 = vadd.f32 %v2732_v37, %v396_v49 }
 0x14b   : > { %v2850_v40 = vadd.f32 %v2847_v36, %v2763_v38  ;;  %v2034_v41 = vpop.f32.mrb[17].mxu0  ;;  %v2889_v57 = vadd.f32 %v1472_v39, %v394_v53  ;;  %v2165_v39 = vld [vmem:[#allocation2] sm:$0xff] (!%p2610_p9)  ;;  %v2171_v53 = vld [vmem:[#allocation2 + $0x30] sm:$0xff] (!%p2610_p9) }
 0x14c   : > { %v2856_v43 = vadd.f32 %v2853_v46, %v2034_v41  ;;  %v2764_v44 = vpop.f32.mrb[18].mxu0  ;;  %v3525_v41 = vld [vmem:[%s3641_s3] ss:$0 sm:$0xff] (!%p2610_p9) }
 0x14d   : > { %2147 = vst [vmem:[#allocation2 + $0x90] sm:$0xff] %v2850_v40  ;;  %v2862_v47 = vadd.f32 %v2859_v19, %v2764_v44  ;;  %v2037_v48 = vpop.f32.mrb[19].mxu0  ;;  %v3520_v40 = vld [vmem:[%s3640_s2] ss:$0 sm:$0xff] (!%p2610_p9)  ;;  %v2167_v44 = vld [vmem:[#allocation2 + $0x10] sm:$0xff] (!%p2610_p9) }
 0x14e   : > { %2145 = vst [vmem:[#allocation2 + $0x80] sm:$0xff] %v2856_v43  ;;  %v2868_v50 = vadd.f32 %v2865_v27, %v2037_v48  ;;  %v2204_v42 = vmul.f32 (!%p2610_p9), %v3520_v40, %v2165_v39  ;;  %v2166_v43 = vld [vmem:[#allocation2 + $0x8] sm:$0xff] (!%p2610_p9)  ;;  %v2206_v48 = vmul.f32 (!%p2610_p9), %v3520_v40, %v2167_v44  ;;  %v2207_v49 = vmul.f32 (!%p2610_p9), %v3520_v40, %v2168_v45 }
 0x14f   : > { %2148 = vst [vmem:[#allocation2 + $0x98] sm:$0xff] %v2862_v47  ;;  %v2735_v59 = vpop.f32.mrb[24].mxu1  ;;  %v2205_v47 = vmul.f32 (!%p2610_p9), %v3520_v40, %v2166_v43 }
 0x150   : > { %2146 = vst [vmem:[#allocation2 + $0x88] sm:$0xff] %v2868_v50  ;;  %v1485_v62 = vpop.f32.mrb[25].mxu1  ;;  %v2895_v11 = vadd.f32 %v2735_v59, %v399_v8  ;;  %v2169_v50 = vld [vmem:[#allocation2 + $0x20] sm:$0xff] (!%p2610_p9)  ;;  %v2172_v59 = vld [vmem:[#allocation2 + $0x38] sm:$0xff] (!%p2610_p9)  ;;  %v2175_v8 = vld [vmem:[#allocation2 + $0x50] sm:$0xff] (!%p2610_p9) }
 0x151   : > { %v2736_v1 = vpop.f32.mrb[26].mxu1  ;;  %v2901_v20 = vadd.f32 %v1485_v62, %v397_v29  ;;  %v2246_v62 = vadd.f32 (!%p2610_p9), %v3525_v41, %v2207_v49  ;;  %v2176_v29 = vld [vmem:[#allocation2 + $0x58] sm:$0xff] (!%p2610_p9) }
 0x152   : > { %v2767_v58 = vpop.f32.mrb[20].mxu0  ;;  %v1488_v6 = vpop.f32.mrb[27].mxu1  ;;  %v2907_v26 = vadd.f32 %v2736_v1, %v400_v10 }
 0x153   : > { %v2874_v60 = vadd.f32 %v2871_v52, %v2767_v58  ;;  %v2050_v61 = vpop.f32.mrb[21].mxu0  ;;  %v2913_v12 = vadd.f32 %v1488_v6, %v398_v9  ;;  %v2170_v52 = vld [vmem:[#allocation2 + $0x28] sm:$0xff] (!%p2610_p9)  ;;  %v2210_v58 = vmul.f32 (!%p2610_p9), %v3520_v40, %v2171_v53  ;;  %v2278_v9 = vmax.f32 (!%p2610_p9), %v2246_v62, 0.0 }
 0x154   : > { %v2880_v63 = vadd.f32 %v2877_v54, %v2050_v61  ;;  %v2768_v0 = vpop.f32.mrb[22].mxu0  ;;  %v2243_v54 = vadd.f32 (!%p2610_p9), %v3525_v41, %v2204_v42  ;;  %v2245_v61 = vadd.f32 (!%p2610_p9), %v3525_v41, %v2206_v48 }
 0x155   : > { %2151 = vst [vmem:[#allocation2 + $0xb0] sm:$0xff] %v2874_v60  ;;  %v2886_v2 = vadd.f32 %v2883_v55, %v2768_v0  ;;  %v2053_v5 = vpop.f32.mrb[23].mxu0  ;;  %v2208_v55 = vmul.f32 (!%p2610_p9), %v3520_v40, %v2169_v50  ;;  %v2244_v60 = vadd.f32 (!%p2610_p9), %v3525_v41, %v2205_v47  ;;  %v2173_v0 = vld [vmem:[#allocation2 + $0x40] sm:$0xff] (!%p2610_p9)  ;;  %v2249_v6 = vadd.f32 (!%p2610_p9), %v3525_v41, %v2210_v58 }
 0x156   : > { %2149 = vst [vmem:[#allocation2 + $0xa0] sm:$0xff] %v2880_v63  ;;  %v2892_v7 = vadd.f32 %v2889_v57, %v2053_v5  ;;  %v2209_v57 = vmul.f32 (!%p2610_p9), %v3520_v40, %v2170_v52  ;;  %v2211_v63 = vmul.f32 (!%p2610_p9), %v3520_v40, %v2172_v59  ;;  %v2275_v1 = vmax.f32 (!%p2610_p9), %v2243_v54, 0.0  ;;  %2310 = vst [vmem:[%s3156_s13 + $0x18] sm:$0xff] (!%p2610_p9), %v2278_v9 }
 0x157   : > { %2152 = vst [vmem:[#allocation2 + $0xb8] sm:$0xff] %v2886_v2  ;;  %v2247_v2 = vadd.f32 (!%p2610_p9), %v3525_v41, %v2208_v55  ;;  %v2276_v10 = vmax.f32 (!%p2610_p9), %v2244_v60, 0.0 }
 0x158   : > { %2150 = vst [vmem:[#allocation2 + $0xa8] sm:$0xff] %v2892_v7  ;;  %v2248_v5 = vadd.f32 (!%p2610_p9), %v3525_v41, %v2209_v57  ;;  %v2174_v7 = vld [vmem:[#allocation2 + $0x48] sm:$0xff] (!%p2610_p9)  ;;  %2307 = vst [vmem:[%s3156_s13] sm:$0xff] (!%p2610_p9), %v2275_v1 }
 0x159   : > { %2308 = vst [vmem:[%s3156_s13 + $0x8] sm:$0xff] (!%p2610_p9), %v2276_v10 }
 0x15a   : > { %v2771_v15 = vpop.f32.mrb[24].mxu0 }
 0x15b   : > { %v2739_v13 = vpop.f32.mrb[28].mxu1  ;;  %v2898_v16 = vadd.f32 %v2895_v11, %v2771_v15  ;;  %v2066_v18 = vpop.f32.mrb[25].mxu0  ;;  %v2277_v11 = vmax.f32 (!%p2610_p9), %v2245_v61, 0.0  ;;  %v2279_v15 = vmax.f32 (!%p2610_p9), %v2247_v2, 0.0 }
 0x15c   : > { %v1501_v17 = vpop.f32.mrb[29].mxu1  ;;  %v2904_v22 = vadd.f32 %v2901_v20, %v2066_v18  ;;  %v2772_v28 = vpop.f32.mrb[26].mxu0  ;;  %v2919_v33 = vadd.f32 %v2739_v13, %v403_v21  ;;  %v2250_v20 = vadd.f32 (!%p2610_p9), %v3525_v41, %v2211_v63  ;;  %v2179_v13 = vld [vmem:[#allocation2 + $0x70] sm:$0xff] (!%p2610_p9)  ;;  %v2212_v18 = vmul.f32 (!%p2610_p9), %v3520_v40, %v2173_v0  ;;  %v2180_v21 = vld [vmem:[#allocation2 + $0x78] sm:$0xff] (!%p2610_p9) }
 0x15d   : > { %v2740_v23 = vpop.f32.mrb[30].mxu1  ;;  %2155 = vst [vmem:[#allocation2 + $0xd0] sm:$0xff] %v2898_v16  ;;  %v2910_v31 = vadd.f32 %v2907_v26, %v2772_v28  ;;  %v2069_v51 = vpop.f32.mrb[27].mxu0  ;;  %v2925_v35 = vadd.f32 %v1501_v17, %v401_v30  ;;  %v2177_v26 = vld [vmem:[#allocation2 + $0x60] sm:$0xff] (!%p2610_p9)  ;;  %v2280_v16 = vmax.f32 (!%p2610_p9), %v2248_v5, 0.0  ;;  %v2281_v17 = vmax.f32 (!%p2610_p9), %v2249_v6, 0.0 }
 0x15e   : > { %v1504_v32 = vpop.f32.mrb[31].mxu1  ;;  %2153 = vst [vmem:[#allocation2 + $0xc0] sm:$0xff] %v2904_v22  ;;  %v2916_v3 = vadd.f32 %v2913_v12, %v2069_v51  ;;  %v2931_v24 = vadd.f32 %v2740_v23, %v404_v56  ;;  %v2178_v12 = vld [vmem:[#allocation2 + $0x68] sm:$0xff] (!%p2610_p9)  ;;  %2309 = vst [vmem:[%s3156_s13 + $0x10] sm:$0xff] (!%p2610_p9), %v2277_v11  ;;  %v2282_v22 = vmax.f32 (!%p2610_p9), %v2250_v20, 0.0  ;;  %v2213_v23 = vmul.f32 (!%p2610_p9), %v3520_v40, %v2174_v7  ;;  %v2185_v43 = vld [vmem:[#allocation2 + $0xa0] sm:$0xff] (!%p2610_p9) }
 0x15f   : > { %2156 = vst [vmem:[#allocation2 + $0xd8] sm:$0xff] %v2910_v31  ;;  %v2937_v36 = vadd.f32 %v1504_v32, %v402_v34  ;;  %v2214_v28 = vmul.f32 (!%p2610_p9), %v3520_v40, %v2175_v8  ;;  %v2215_v30 = vmul.f32 (!%p2610_p9), %v3520_v40, %v2176_v29  ;;  %2311 = vst [vmem:[%s3156_s13 + $0x20] sm:$0xff] (!%p2610_p9), %v2279_v15  ;;  %v2186_v44 = vld [vmem:[#allocation2 + $0xa8] sm:$0xff] (!%p2610_p9)  ;;  %v2187_v45 = vld [vmem:[#allocation2 + $0xb0] sm:$0xff] (!%p2610_p9) }
 0x160   : > { %2154 = vst [vmem:[#allocation2 + $0xc8] sm:$0xff] %v2916_v3  ;;  %2312 = vst [vmem:[%s3156_s13 + $0x28] sm:$0xff] (!%p2610_p9), %v2280_v16  ;;  %v2251_v31 = vadd.f32 (!%p2610_p9), %v3525_v41, %v2212_v18  ;;  %v2216_v32 = vmul.f32 (!%p2610_p9), %v3520_v40, %v2177_v26  ;;  %v2217_v51 = vmul.f32 (!%p2610_p9), %v3520_v40, %v2178_v12  ;;  %v2188_v52 = vld [vmem:[#allocation2 + $0xb8] sm:$0xff] (!%p2610_p9) }
 0x161   : > { %2313 = vst [vmem:[%s3156_s13 + $0x30] sm:$0xff] (!%p2610_p9), %v2281_v17  ;;  %v2218_v56 = vmul.f32 (!%p2610_p9), %v3520_v40, %v2179_v13  ;;  %2314 = vst [vmem:[%s3156_s13 + $0x38] sm:$0xff] (!%p2610_p9), %v2282_v22  ;;  %v2252_v3 = vadd.f32 (!%p2610_p9), %v3525_v41, %v2213_v23  ;;  %v2254_v34 = vadd.f32 (!%p2610_p9), %v3525_v41, %v2215_v30 }
 0x162   : > { %v2775_v25 = vpop.f32.mrb[28].mxu0  ;;  %2164 = sbr.rel (%p2610_p9) target bundleno = 375 (0x177), region = 44  ;;  %v2224_v59 = vmul.f32 (!%p2610_p9), %v3520_v40, %v2185_v43  ;;  %v2225_v60 = vmul.f32 (!%p2610_p9), %v3520_v40, %v2186_v44  ;;  %v2226_v61 = vmul.f32 (!%p2610_p9), %v3520_v40, %v2187_v45  ;;  %v2227_v1 = vmul.f32 (!%p2610_p9), %v3520_v40, %v2188_v52 }
 0x163   : > { %v2922_v4 = vadd.f32 %v2919_v33, %v2775_v25  ;;  %v2082_v46 = vpop.f32.mrb[29].mxu0  ;;  %v2253_v33 = vadd.f32 (!%p2610_p9), %v3525_v41, %v2214_v28  ;;  %v2255_v25 = vadd.f32 (!%p2610_p9), %v3525_v41, %v2216_v32  ;;  %v2286_v39 = vmax.f32 (!%p2610_p9), %v2254_v34, 0.0 }
 0x164   : > { %v2928_v14 = vadd.f32 %v2925_v35, %v2082_v46  ;;  %v2776_v19 = vpop.f32.mrb[30].mxu0  ;;  %v2219_v35 = vmul.f32 (!%p2610_p9), %v3520_v40, %v2180_v21  ;;  %v2257_v46 = vadd.f32 (!%p2610_p9), %v3525_v41, %v2218_v56  ;;  %v2263_v6 = vadd.f32 (!%p2610_p9), %v3525_v41, %v2224_v59  ;;  %v2191_v10 = vld [vmem:[#allocation2 + $0xd0] sm:$0xff] (!%p2610_p9) }
 0x165   : > { %2159 = vst [vmem:[#allocation2 + $0xf0] sm:$0xff] %v2922_v4  ;;  %v2934_v37 = vadd.f32 %v2931_v24, %v2776_v19  ;;  %v2085_v27 = vpop.f32.mrb[31].mxu0  ;;  %v2181_v24 = vld [vmem:[#allocation2 + $0x80] sm:$0xff] (!%p2610_p9)  ;;  %v2256_v4 = vadd.f32 (!%p2610_p9), %v3525_v41, %v2217_v51  ;;  %v2183_v19 = vld [vmem:[#allocation2 + $0x90] sm:$0xff] (!%p2610_p9)  ;;  %v2287_v47 = vmax.f32 (!%p2610_p9), %v2255_v25, 0.0  ;;  %2318 = vst [vmem:[%s3156_s13 + $0x58] sm:$0xff] (!%p2610_p9), %v2286_v39  ;;  %v2264_v7 = vadd.f32 (!%p2610_p9), %v3525_v41, %v2225_v60 }
 0x166   : > { %2157 = vst [vmem:[#allocation2 + $0xe0] sm:$0xff] %v2928_v14  ;;  %v2940_v38 = vadd.f32 %v2937_v36, %v2085_v27  ;;  %v2283_v36 = vmax.f32 (!%p2610_p9), %v2251_v31, 0.0  ;;  %v2182_v14 = vld [vmem:[#allocation2 + $0x88] sm:$0xff] (!%p2610_p9)  ;;  %v2284_v27 = vmax.f32 (!%p2610_p9), %v2252_v3, 0.0  ;;  %v2258_v42 = vadd.f32 (!%p2610_p9), %v3525_v41, %v2219_v35  ;;  %v2189_v2 = vld [vmem:[#allocation2 + $0xc0] sm:$0xff] (!%p2610_p9)  ;;  %v2192_v11 = vld [vmem:[#allocation2 + $0xd8] sm:$0xff] (!%p2610_p9) }
 0x167   : > { %2160 = vst [vmem:[#allocation2 + $0xf8] sm:$0xff] %v2934_v37  ;;  %v2184_v37 = vld [vmem:[#allocation2 + $0x98] sm:$0xff] (!%p2610_p9)  ;;  %v2288_v48 = vmax.f32 (!%p2610_p9), %v2256_v4, 0.0  ;;  %v2289_v49 = vmax.f32 (!%p2610_p9), %v2257_v46, 0.0  ;;  %v2220_v50 = vmul.f32 (!%p2610_p9), %v3520_v40, %v2181_v24  ;;  %v2221_v54 = vmul.f32 (!%p2610_p9), %v3520_v40, %v2182_v14  ;;  %2319 = vst [vmem:[%s3156_s13 + $0x60] sm:$0xff] (!%p2610_p9), %v2287_v47  ;;  %v2190_v29 = vld [vmem:[#allocation2 + $0xc8] sm:$0xff] (!%p2610_p9) }
 0x168   : > { %2158 = vst [vmem:[#allocation2 + $0xe8] sm:$0xff] %v2940_v38  ;;  %v2285_v38 = vmax.f32 (!%p2610_p9), %v2253_v33, 0.0  ;;  %2315 = vst [vmem:[%s3156_s13 + $0x40] sm:$0xff] (!%p2610_p9), %v2283_v36  ;;  %v2290_v53 = vmax.f32 (!%p2610_p9), %v2258_v42, 0.0  ;;  %v2222_v55 = vmul.f32 (!%p2610_p9), %v3520_v40, %v2183_v19  ;;  %v2223_v57 = vmul.f32 (!%p2610_p9), %v3520_v40, %v2184_v37 }
 0x169   : > { %2316 = vst [vmem:[%s3156_s13 + $0x48] sm:$0xff] %v2284_v27  ;;  %2320 = vst [vmem:[%s3156_s13 + $0x68] sm:$0xff] %v2288_v48  ;;  %v2259_v58 = vadd.f32 %v3525_v41, %v2220_v50  ;;  %v2260_v62 = vadd.f32 %v3525_v41, %v2221_v54  ;;  %v2265_v8 = vadd.f32 %v3525_v41, %v2226_v61  ;;  %v2295_v17 = vmax.f32 %v2263_v6, 0.0 }
 0x16a   : > { %2317 = vst [vmem:[%s3156_s13 + $0x50] sm:$0xff] %v2285_v38  ;;  %2321 = vst [vmem:[%s3156_s13 + $0x70] sm:$0xff] %v2289_v49  ;;  %v2261_v63 = vadd.f32 %v3525_v41, %v2222_v55  ;;  %v2262_v0 = vadd.f32 %v3525_v41, %v2223_v57  ;;  %v2266_v12 = vadd.f32 %v3525_v41, %v2227_v1  ;;  %v2296_v18 = vmax.f32 %v2264_v7, 0.0 }
 0x16b   : > { %2322 = vst [vmem:[%s3156_s13 + $0x78] sm:$0xff] %v2290_v53  ;;  %v2291_v5 = vmax.f32 %v2259_v58, 0.0  ;;  %v2292_v9 = vmax.f32 %v2260_v62, 0.0  ;;  %v2297_v21 = vmax.f32 %v2265_v8, 0.0  ;;  %v2228_v22 = vmul.f32 %v3520_v40, %v2189_v2  ;;  %2327 = vst [vmem:[%s3156_s13 + $0xa0] sm:$0xff] %v2295_v17 }
 0x16c   : > { %v2293_v20 = vmax.f32 %v2261_v63, 0.0  ;;  %v2294_v26 = vmax.f32 %v2262_v0, 0.0  ;;  %v2195_v16 = vld [vmem:[#allocation2 + $0xf0] sm:$0xff]  ;;  %v2298_v28 = vmax.f32 %v2266_v12, 0.0  ;;  %v2229_v30 = vmul.f32 %v3520_v40, %v2190_v29  ;;  %2328 = vst [vmem:[%s3156_s13 + $0xa8] sm:$0xff] %v2296_v18 }
 0x16d   : > { %v2193_v13 = vld [vmem:[#allocation2 + $0xe0] sm:$0xff]  ;;  %2323 = vst [vmem:[%s3156_s13 + $0x80] sm:$0xff] %v2291_v5  ;;  %2324 = vst [vmem:[%s3156_s13 + $0x88] sm:$0xff] %v2292_v9  ;;  %v2230_v31 = vmul.f32 %v3520_v40, %v2191_v10  ;;  %v2231_v32 = vmul.f32 %v3520_v40, %v2192_v11  ;;  %v2267_v51 = vadd.f32 %v3525_v41, %v2228_v22 }
 0x16e   : > { %v2196_v23 = vld [vmem:[#allocation2 + $0xf8] sm:$0xff]  ;;  %2325 = vst [vmem:[%s3156_s13 + $0x90] sm:$0xff] %v2293_v20  ;;  %2326 = vst [vmem:[%s3156_s13 + $0x98] sm:$0xff] %v2294_v26  ;;  %v2232_v56 = vmul.f32 %v3520_v40, %v2193_v13  ;;  %v2234_v33 = vmul.f32 %v3520_v40, %v2195_v16  ;;  %v2268_v34 = vadd.f32 %v3525_v41, %v2229_v30 }
 0x16f   : > { %v2194_v15 = vld [vmem:[#allocation2 + $0xe8] sm:$0xff]  ;;  %2329 = vst [vmem:[%s3156_s13 + $0xb0] sm:$0xff] %v2297_v21  ;;  %2330 = vst [vmem:[%s3156_s13 + $0xb8] sm:$0xff] %v2298_v28  ;;  %v2269_v35 = vadd.f32 %v3525_v41, %v2230_v31  ;;  %v2270_v24 = vadd.f32 %v3525_v41, %v2231_v32  ;;  %v2235_v36 = vmul.f32 %v3520_v40, %v2196_v23  ;;  %v2299_v25 = vmax.f32 %v2267_v51, 0.0 }
 0x170   : > { %v2233_v3 = vmul.f32 %v3520_v40, %v2194_v15  ;;  %v2271_v4 = vadd.f32 %v3525_v41, %v2232_v56  ;;  %v2273_v14 = vadd.f32 %v3525_v41, %v2234_v33  ;;  %v2300_v19 = vmax.f32 %v2268_v34, 0.0 }
 0x171   : > { %v2301_v37 = vmax.f32 %v2269_v35, 0.0  ;;  %v2302_v27 = vmax.f32 %v2270_v24, 0.0  ;;  %v2274_v38 = vadd.f32 %v3525_v41, %v2235_v36  ;;  %2331 = vst [vmem:[%s3156_s13 + $0xc0] sm:$0xff] %v2299_v25 }
 0x172   : > { %v2272_v46 = vadd.f32 %v3525_v41, %v2233_v3  ;;  %v2303_v39 = vmax.f32 %v2271_v4, 0.0  ;;  %v2305_v40 = vmax.f32 %v2273_v14, 0.0  ;;  %2332 = vst [vmem:[%s3156_s13 + $0xc8] sm:$0xff] %v2300_v19 }
 0x173   : > { %2333 = vst [vmem:[%s3156_s13 + $0xd0] sm:$0xff] %v2301_v37  ;;  %2334 = vst [vmem:[%s3156_s13 + $0xd8] sm:$0xff] %v2302_v27  ;;  %v2306_v43 = vmax.f32 %v2274_v38, 0.0 }
 0x174   : > { %v2304_v42 = vmax.f32 %v2272_v46, 0.0  ;;  %2335 = vst [vmem:[%s3156_s13 + $0xe0] sm:$0xff] %v2303_v39  ;;  %2337 = vst [vmem:[%s3156_s13 + $0xf0] sm:$0xff] %v2305_v40 }
 0x175   : > { %2338 = vst [vmem:[%s3156_s13 + $0xf8] sm:$0xff] %v2306_v43 }
 0x176   : > { %2336 = vst [vmem:[%s3156_s13 + $0xe8] sm:$0xff] %v2304_v42 }
 0x177 PF: > { %s14_s19 = sadd.s32 1, %s3077_s19   ;;  %s3647_s15 = smov %s3069_s17 }
 0x178   : > { %p11_p10 = scmp.ge.s32.totalorder %s14_s19, 8   ;;  %s3648_s16 = smov %s3073_s18 }
 0x179   : > { %s3649_s17 = smov %s3652_s20  ;;  %s3650_s18 = smov %s3656_s21 }
 0x17a   :  { %13 = sbr.rel (!%p11_p10) target bundleno = 3 (0x3), region = 85 }

</bundles_post_ra>
